<compile_context>
chip_gen: v7x
topology: tpu7x:2x2x1
jax: 0.10.0
libtpu: 0.0.40
codegen_flags: <defaults>
</compile_context>

<pallas_src>
import numpy as np
import jax
import jax.numpy as jnp
from jax.experimental import pallas as pl
from jax.experimental.pallas import tpu as pltpu


def _softplus(x):
    return jax.nn.softplus(x)


# ----------------------------------------------------------------------------
# Prep kernel: per-group effective weight/bias mean & sigma + ARD scale.
# Runs once per group -- the softplus/EUP work is no longer redone per sample.
# ----------------------------------------------------------------------------
def _prep_kernel(gwmu_ref, gwrho_ref, gbmu_ref, gbrho_ref,
                 rwmu_ref, rwrho_ref, rbmu_ref, rbrho_ref,
                 alpha_ref, beta_ref,
                 wmu_out, wsig_out, bmu_out, bsig_out, ard_out):
    gw_sigma = _softplus(gwrho_ref[...])                       # (OUT, IN)
    wmu_out[0] = gwmu_ref[...] + gw_sigma * rwmu_ref[0]        # (OUT, IN)
    wsig_out[0] = gw_sigma * _softplus(rwrho_ref[0])           # (OUT, IN)

    gb_sigma = _softplus(gbrho_ref[...])                       # (1, OUT)
    bmu_out[0] = gbmu_ref[...] + gb_sigma * rbmu_ref[0]        # (1, OUT)
    bsig_out[0] = gb_sigma * _softplus(rbrho_ref[0])           # (1, OUT)

    # Written every step with the same value (tiny); resident output block.
    ard_out[...] = _softplus(alpha_ref[...]) * _softplus(beta_ref[...])


def _prep_pallas(params):
    OUT, IN = params["group_weight_mu"].shape
    G = params["raw_weight_mu"].shape[0]
    gb_mu = params["group_bias_mu"].reshape(1, OUT)
    gb_rho = params["group_bias_rho"].reshape(1, OUT)
    rb_mu = params["raw_bias_mu"].reshape(G, 1, OUT)
    rb_rho = params["raw_bias_rho"].reshape(G, 1, OUT)
    alpha = params["ard_alpha"].reshape(1, IN)
    beta = params["ard_beta"].reshape(1, IN)

    inv2 = lambda g: (0, 0)
    inv3 = lambda g: (g, 0, 0)
    return pl.pallas_call(
        _prep_kernel,
        grid=(G,),
        in_specs=[
            pl.BlockSpec((OUT, IN), inv2),       # group_weight_mu   (invariant)
            pl.BlockSpec((OUT, IN), inv2),       # group_weight_rho  (invariant)
            pl.BlockSpec((1, OUT), inv2),        # group_bias_mu
            pl.BlockSpec((1, OUT), inv2),        # group_bias_rho
            pl.BlockSpec((1, OUT, IN), inv3),    # raw_weight_mu[g]
            pl.BlockSpec((1, OUT, IN), inv3),    # raw_weight_rho[g]
            pl.BlockSpec((1, 1, OUT), inv3),     # raw_bias_mu[g]
            pl.BlockSpec((1, 1, OUT), inv3),     # raw_bias_rho[g]
            pl.BlockSpec((1, IN), inv2),         # ard_alpha
            pl.BlockSpec((1, IN), inv2),         # ard_beta
        ],
        out_specs=[
            pl.BlockSpec((1, OUT, IN), inv3),    # eff_w_mu
            pl.BlockSpec((1, OUT, IN), inv3),    # eff_w_sigma
            pl.BlockSpec((1, 1, OUT), inv3),     # eff_b_mu
            pl.BlockSpec((1, 1, OUT), inv3),     # eff_b_sigma
            pl.BlockSpec((1, IN), inv2),         # ard scale
        ],
        out_shape=[
            jax.ShapeDtypeStruct((G, OUT, IN), jnp.float32),
            jax.ShapeDtypeStruct((G, OUT, IN), jnp.float32),
            jax.ShapeDtypeStruct((G, 1, OUT), jnp.float32),
            jax.ShapeDtypeStruct((G, 1, OUT), jnp.float32),
            jax.ShapeDtypeStruct((1, IN), jnp.float32),
        ],
        compiler_params=pltpu.CompilerParams(dimension_semantics=("arbitrary",)),
    )(params["group_weight_mu"], params["group_weight_rho"], gb_mu, gb_rho,
      params["raw_weight_mu"], params["raw_weight_rho"], rb_mu, rb_rho,
      alpha, beta)


# ----------------------------------------------------------------------------
# Forward kernel: one batch tile (TB samples, single group) per grid step.
#   out = (x*ard) @ eff_w_mu^T                       <- shared MXU matmul
#       + sum_i (x*ard)_i * eff_w_sigma[:,i] * eps_i <- per-sample VPU term
#       + eff_b_mu + eff_b_sigma * eps_b
# ----------------------------------------------------------------------------
def _fwd_kernel(tgid_ref,       # scalar prefetch (SMEM): per-tile group id
                x_ref,          # (TB, IN)
                nw_ref,         # (TB, OUT, IN)  weight noise (bf16 or f32)
                nb_ref,         # (TB, OUT)      bias noise
                wmu_ref,        # (1, OUT, IN)   eff weight mean, gathered by group
                wsig_ref,       # (1, OUT, IN)   eff weight sigma
                bmu_ref,        # (1, 1, OUT)    eff bias mean
                bsig_ref,       # (1, 1, OUT)    eff bias sigma
                ard_ref,        # (1, IN)        ARD scale (grid-invariant)
                out_ref):       # (TB, OUT)
    del tgid_ref  # consumed only by the index_maps

    xs = x_ref[...] * ard_ref[...]                              # (TB, IN)

    # Shared group-mean term on the MXU: (TB, IN) x (OUT, IN)^T -> (TB, OUT).
    out_mu = jax.lax.dot_general(
        xs, wmu_ref[0],
        dimension_numbers=(((1,), (1,)), ((), ())),
        preferred_element_type=jnp.float32)

    # Per-sample noise term (elementwise + lane reduce).
    nw = nw_ref[...].astype(jnp.float32)                        # (TB, OUT, IN)
    noise_term = jnp.sum((wsig_ref[0][None, :, :] * nw) * xs[:, None, :],
                         axis=-1)                               # (TB, OUT)

    bias = bmu_ref[0] + bsig_ref[0] * nb_ref[...].astype(jnp.float32)  # (TB, OUT)

    out_ref[...] = (out_mu + noise_term + bias).astype(out_ref.dtype)


def forward_pallas(params, x, group_ids, noise_w, noise_b, *, tb=8):
    B, IN = x.shape
    OUT = params["group_weight_mu"].shape[0]
    G = params["raw_weight_mu"].shape[0]
    group_ids = group_ids.astype(jnp.int32)

    # Batch-invariant precompute (hoisted softplus / reparam composition).
    eff_w_mu, eff_w_sigma, eff_b_mu, eff_b_sigma, ard = _prep_pallas(params)

    # --- MoE-style schedule: sort samples by group, pad each group up to a
    # multiple of tb so every tile holds a single group.  Static capacity.
    n_tiles = pl.cdiv(B, tb) + G                  # worst-case number of tiles
    C = n_tiles * tb

    counts = jnp.bincount(group_ids, length=G)                        # (G,)
    tiles_per_group = (counts + tb - 1) // tb
    group_tile_base = jnp.cumsum(tiles_per_group) - tiles_per_group   # exclusive
    group_row_base = (group_tile_base * tb).astype(jnp.int32)

    perm = jnp.argsort(group_ids)                                     # group-sorted order
    sorted_gid = group_ids[perm]
    counts_start = (jnp.cumsum(counts) - counts).astype(jnp.int32)
    rank = jnp.arange(B, dtype=jnp.int32) - counts_start[sorted_gid]
    dest = group_row_base[sorted_gid] + rank                          # padded row per sample

    xp = jnp.zeros((C, IN), x.dtype).at[dest].set(x[perm])
    nwp = jnp.zeros((C, OUT, IN), noise_w.dtype).at[dest].set(noise_w[perm])
    nbp = jnp.zeros((C, OUT), noise_b.dtype).at[dest].set(noise_b[perm])
    tile_gid = jnp.zeros((n_tiles,), jnp.int32).at[dest // tb].set(sorted_gid)

    grid_spec = pltpu.PrefetchScalarGridSpec(
        num_scalar_prefetch=1,
        grid=(n_tiles,),
        in_specs=[
            pl.BlockSpec((tb, IN), lambda t, tg: (t, 0)),             # x (padded)
            pl.BlockSpec((tb, OUT, IN), lambda t, tg: (t, 0, 0)),     # noise_w
            pl.BlockSpec((tb, OUT), lambda t, tg: (t, 0)),            # noise_b
            pl.BlockSpec((1, OUT, IN), lambda t, tg: (tg[t], 0, 0)),  # eff_w_mu[g]
            pl.BlockSpec((1, OUT, IN), lambda t, tg: (tg[t], 0, 0)),  # eff_w_sigma[g]
            pl.BlockSpec((1, 1, OUT), lambda t, tg: (tg[t], 0, 0)),   # eff_b_mu[g]
            pl.BlockSpec((1, 1, OUT), lambda t, tg: (tg[t], 0, 0)),   # eff_b_sigma[g]
            pl.BlockSpec((1, IN), lambda t, tg: (0, 0)),              # ard (invariant)
        ],
        out_specs=pl.BlockSpec((tb, OUT), lambda t, tg: (t, 0)),      # lane-dense 2-D out
    )

    out_padded = pl.pallas_call(
        _fwd_kernel,
        grid_spec=grid_spec,
        out_shape=jax.ShapeDtypeStruct((C, OUT), jnp.float32),
        compiler_params=pltpu.CompilerParams(
            dimension_semantics=("parallel",),       # batch tiles independent
            vmem_limit_bytes=32 * 1024 * 1024),
    )(tile_gid, xp, nwp, nbp, eff_w_mu, eff_w_sigma, eff_b_mu, eff_b_sigma, ard)

    # Unscatter padded/sorted rows back to the original batch order.
    out_sorted = out_padded[dest]                                     # (B, OUT)
    return jnp.zeros((B, OUT), out_sorted.dtype).at[perm].set(out_sorted)


# ----------------------------------------------------------------------------
# KL kernel: reduction tiled over the group axis with a resident (1,1)
# accumulator output (keeps raw_weight_* blocks VMEM-sized at production G).
# ----------------------------------------------------------------------------
def _kl_kernel(gwmu_ref, gwrho_ref, gbrho_ref,
               rwmu_ref, rwrho_ref, alpha_ref, beta_ref, kl_ref):
    log_two_pi = jnp.log(jnp.float32(2.0 * np.pi))
    g = pl.program_id(0)

    # Per-group individual term of the HierarchicalNormalPrior.
    rws = _softplus(rwrho_ref[0])
    rmu = rwmu_ref[0]
    indiv_kl = jnp.sum(-0.5 * log_two_pi - jnp.log(rws)
                       + (rws ** 2 + rmu ** 2) * 0.5 - 0.5)

    @pl.when(g == 0)
    def _():
        gws = _softplus(gwrho_ref[...])
        gbs = _softplus(gbrho_ref[...])
        gmu = gwmu_ref[...]
        # HierarchicalNormalPrior group term (group_mu=0, group_var=1).
        group_kl = jnp.sum(-jnp.log(gws) + (gws ** 2 + gmu ** 2) * 0.5 - 0.5)

        # HalfNormalHyperPrior (scale = 1).
        def half_normal_kl(sigma):
            ls = jnp.log(sigma)
            return jnp.sum(-0.5 * log_two_pi - ls + (ls ** 2 + sigma ** 2) * 0.5 - 0.5)

        ard_kl = jnp.sum(_softplus(alpha_ref[...])) + jnp.sum(_softplus(beta_ref[...]))
        kl_ref[...] = jnp.full((1, 1),
                               group_kl + half_normal_kl(gws) + half_normal_kl(gbs) + ard_kl,
                               jnp.float32)

    kl_ref[...] = kl_ref[...] + indiv_kl


def kl_pallas(params):
    OUT, IN = params["group_weight_mu"].shape
    G = params["raw_weight_mu"].shape[0]
    gb_rho = params["group_bias_rho"].reshape(1, OUT)
    alpha = params["ard_alpha"].reshape(1, IN)
    beta = params["ard_beta"].reshape(1, IN)
    inv2 = lambda g: (0, 0)
    inv3 = lambda g: (g, 0, 0)
    kl = pl.pallas_call(
        _kl_kernel,
        grid=(G,),
        in_specs=[
            pl.BlockSpec((OUT, IN), inv2),     # group_weight_mu  (invariant)
            pl.BlockSpec((OUT, IN), inv2),     # group_weight_rho (invariant)
            pl.BlockSpec((1, OUT), inv2),      # group_bias_rho
            pl.BlockSpec((1, OUT, IN), inv3),  # raw_weight_mu[g]
            pl.BlockSpec((1, OUT, IN), inv3),  # raw_weight_rho[g]
            pl.BlockSpec((1, IN), inv2),       # ard_alpha
            pl.BlockSpec((1, IN), inv2),       # ard_beta
        ],
        out_specs=pl.BlockSpec((1, 1), inv2),
        out_shape=jax.ShapeDtypeStruct((1, 1), jnp.float32),
        compiler_params=pltpu.CompilerParams(dimension_semantics=("arbitrary",)),
    )(params["group_weight_mu"], params["group_weight_rho"], gb_rho,
      params["raw_weight_mu"], params["raw_weight_rho"], alpha, beta)
    return kl[0, 0]


# ----------------------------------------------------------------------------
# Pure-JAX reference (mirrors the PyTorch forward / kl_loss exactly).
# ----------------------------------------------------------------------------
def reference(params, x, group_ids, noise_w, noise_b):
    sp = jax.nn.softplus
    gws = sp(params["group_weight_rho"])
    gbs = sp(params["group_bias_rho"])
    rws = sp(params["raw_weight_rho"])
    rbs = sp(params["raw_bias_rho"])

    nw = noise_w.astype(jnp.float32)
    nb = noise_b.astype(jnp.float32)
    raw_w = params["raw_weight_mu"][group_ids] + rws[group_ids] * nw
    raw_b = params["raw_bias_mu"][group_ids] + rbs[group_ids] * nb
    weight = params["group_weight_mu"] + gws * raw_w          # (B, OUT, IN)
    bias = params["group_bias_mu"] + gbs * raw_b              # (B, OUT)

    ard = sp(params["ard_alpha"]) * sp(params["ard_beta"])
    xs = x * ard
    out = jnp.einsum("bi,boi->bo", xs, weight) + bias

    log_two_pi = jnp.log(jnp.float32(2.0 * np.pi))
    gw_mu = params["group_weight_mu"]
    rw_mu = params["raw_weight_mu"]
    group_kl = jnp.sum(-jnp.log(gws) + (gws ** 2 + gw_mu ** 2) / 2.0 - 0.5)
    indiv_kl = jnp.sum(-0.5 * log_two_pi - jnp.log(rws)
                       + (rws ** 2 + rw_mu ** 2) / 2.0 - 0.5)

    def half_normal_kl(sigma):
        ls = jnp.log(sigma)
        return jnp.sum(-0.5 * log_two_pi - ls + (ls ** 2 + sigma ** 2) / 2.0 - 0.5)

    hyper_kl = half_normal_kl(gws) + half_normal_kl(gbs)
    ard_kl = jnp.sum(sp(params["ard_alpha"])) + jnp.sum(sp(params["ard_beta"]))
    return out, group_kl + indiv_kl + hyper_kl + ard_kl


if __name__ == "__main__":
    B, IN, OUT, G, TB = 16, 128, 128, 3, 8

    key = jax.random.PRNGKey(0)
    keys = jax.random.split(key, 8)
    bound = 1.0 / np.sqrt(IN)  # kaiming_uniform with a=sqrt(5) -> 1/sqrt(fan_in)

    params = dict(
        group_weight_mu=jax.random.uniform(keys[0], (OUT, IN), jnp.float32, -bound, bound),
        group_weight_rho=jnp.full((OUT, IN), -5.0, jnp.float32),
        group_bias_mu=jax.random.uniform(keys[1], (OUT,), jnp.float32, -0.1, 0.1),
        group_bias_rho=jnp.full((OUT,), -5.0, jnp.float32),
        raw_weight_mu=jax.random.uniform(keys[2], (G, OUT, IN), jnp.float32, -bound, bound),
        raw_weight_rho=jnp.full((G, OUT, IN), -5.0, jnp.float32),
        raw_bias_mu=jax.random.uniform(keys[3], (G, OUT), jnp.float32, -0.1, 0.1),
        raw_bias_rho=jnp.full((G, OUT), -5.0, jnp.float32),
        ard_alpha=jnp.ones((IN,), jnp.float32),
        ard_beta=jnp.ones((IN,), jnp.float32),
    )

    x = jax.random.normal(keys[4], (B, IN), jnp.float32)
    group_ids = jax.random.randint(keys[5], (B,), 0, G, jnp.int32)
    # Noise streams in bf16 (the dominant O(B*OUT*IN) HBM traffic); the same
    # bf16-rounded values feed the reference so the comparison is exact math.
    noise_w = jax.random.normal(keys[6], (B, OUT, IN), jnp.float32).astype(jnp.bfloat16)
    noise_b = jax.random.normal(keys[7], (B, OUT), jnp.float32)

    out = forward_pallas(params, x, group_ids, noise_w, noise_b, tb=TB)
    kl = kl_pallas(params)
    (out, kl) = jax.block_until_ready((out, kl))

    out_ref, kl_ref = reference(params, x, group_ids, noise_w, noise_b)
    assert out.shape == (B, OUT)
    assert np.allclose(np.asarray(out), np.asarray(out_ref), rtol=1e-4, atol=2e-4), \
        "forward output mismatch vs JAX reference"
    assert np.allclose(float(kl), float(kl_ref), rtol=1e-3, atol=1e-2), \
        "KL mismatch vs JAX reference"

    print("KERNEL_OK")
</pallas_src>

<mosaic_0001>
module attributes {stable_mosaic.version = 11 : i64} {
  func.func @_prep_kernel(%arg0: i32, %arg1: memref<128x128xf32, #tpu.memory_space<vmem>>, %arg2: memref<128x128xf32, #tpu.memory_space<vmem>>, %arg3: memref<1x128xf32, #tpu.memory_space<vmem>>, %arg4: memref<1x128xf32, #tpu.memory_space<vmem>>, %arg5: memref<1x128x128xf32, #tpu.memory_space<vmem>>, %arg6: memref<1x128x128xf32, #tpu.memory_space<vmem>>, %arg7: memref<1x1x128xf32, #tpu.memory_space<vmem>>, %arg8: memref<1x1x128xf32, #tpu.memory_space<vmem>>, %arg9: memref<1x128xf32, #tpu.memory_space<vmem>>, %arg10: memref<1x128xf32, #tpu.memory_space<vmem>>, %arg11: memref<1x128x128xf32, #tpu.memory_space<vmem>>, %arg12: memref<1x128x128xf32, #tpu.memory_space<vmem>>, %arg13: memref<1x1x128xf32, #tpu.memory_space<vmem>>, %arg14: memref<1x1x128xf32, #tpu.memory_space<vmem>>, %arg15: memref<1x128xf32, #tpu.memory_space<vmem>>) attributes {dimension_semantics = [#tpu.dimension_semantics<arbitrary>], iteration_bounds = array<i64: 3>, scalar_prefetch = 0 : i64, scratch_operands = 0 : i64, tpu.core_type = #tpu.core_type<tc>, window_params = [{pipeline_mode = #tpu.pipeline_mode<synchronous>, transform_indices = @transform_0, window_bounds = array<i64: 128, 128>}, {pipeline_mode = #tpu.pipeline_mode<synchronous>, transform_indices = @transform_1, window_bounds = array<i64: 128, 128>}, {pipeline_mode = #tpu.pipeline_mode<synchronous>, transform_indices = @transform_2, window_bounds = array<i64: 1, 128>}, {pipeline_mode = #tpu.pipeline_mode<synchronous>, transform_indices = @transform_3, window_bounds = array<i64: 1, 128>}, {transform_indices = @transform_4, window_bounds = array<i64: 1, 128, 128>}, {transform_indices = @transform_5, window_bounds = array<i64: 1, 128, 128>}, {transform_indices = @transform_6, window_bounds = array<i64: 1, 1, 128>}, {transform_indices = @transform_7, window_bounds = array<i64: 1, 1, 128>}, {pipeline_mode = #tpu.pipeline_mode<synchronous>, transform_indices = @transform_8, window_bounds = array<i64: 1, 128>}, {pipeline_mode = #tpu.pipeline_mode<synchronous>, transform_indices = @transform_9, window_bounds = array<i64: 1, 128>}, {transform_indices = @transform_10, window_bounds = array<i64: 1, 128, 128>}, {transform_indices = @transform_11, window_bounds = array<i64: 1, 128, 128>}, {transform_indices = @transform_12, window_bounds = array<i64: 1, 1, 128>}, {transform_indices = @transform_13, window_bounds = array<i64: 1, 1, 128>}, {pipeline_mode = #tpu.pipeline_mode<synchronous>, transform_indices = @transform_14, window_bounds = array<i64: 1, 128>}]} {
    %c0 = arith.constant 0 : index
    %c0_0 = arith.constant 0 : index
    %0 = vector.load %arg2[%c0, %c0_0] : memref<128x128xf32, #tpu.memory_space<vmem>>, vector<128x128xf32>
    %cst = arith.constant 0.000000e+00 : f32
    %1 = vector.broadcast %cst : f32 to vector<128x128xf32>
    %2 = arith.maximumf %0, %1 : vector<128x128xf32>
    %3 = vector.broadcast %cst : f32 to vector<128x128xf32>
    %4 = arith.subf %0, %3 : vector<128x128xf32>
    %5 = arith.cmpf one, %4, %4 : vector<128x128xf32>
    %6 = vector.broadcast %cst : f32 to vector<128x128xf32>
    %7 = arith.addf %0, %6 : vector<128x128xf32>
    %8 = math.absf %4 : vector<128x128xf32>
    %cst_1 = arith.constant 0.000000e+00 : f32
    %9 = vector.broadcast %cst_1 : f32 to vector<128x128xf32>
    %10 = arith.subf %9, %8 : vector<128x128xf32>
    %11 = math.exp %10 : vector<128x128xf32>
    %12 = math.log1p %11 : vector<128x128xf32>
    %13 = arith.addf %2, %12 : vector<128x128xf32>
    %14 = arith.select %5, %7, %13 : vector<128x128xi1>, vector<128x128xf32>
    %c0_2 = arith.constant 0 : index
    %c0_3 = arith.constant 0 : index
    %15 = vector.load %arg1[%c0_2, %c0_3] : memref<128x128xf32, #tpu.memory_space<vmem>>, vector<128x128xf32>
    %c0_4 = arith.constant 0 : index
    %c0_5 = arith.constant 0 : index
    %c0_6 = arith.constant 0 : index
    %16 = vector.load %arg5[%c0_4, %c0_5, %c0_6] : memref<1x128x128xf32, #tpu.memory_space<vmem>>, vector<1x128x128xf32>
    %17 = vector.shape_cast %16 : vector<1x128x128xf32> to vector<128x128xf32>
    %18 = arith.mulf %14, %17 : vector<128x128xf32>
    %19 = arith.addf %15, %18 : vector<128x128xf32>
    %c0_7 = arith.constant 0 : index
    %c0_8 = arith.constant 0 : index
    %c0_9 = arith.constant 0 : index
    %20 = vector.load %arg11[%c0_7, %c0_8, %c0_9] : memref<1x128x128xf32, #tpu.memory_space<vmem>>, vector<1x128x128xf32>
    %21 = vector.shape_cast %20 : vector<1x128x128xf32> to vector<128x128xf32>
    %22 = vector.shape_cast %19 : vector<128x128xf32> to vector<1x128x128xf32>
    tpu.vector_store %arg11[%c0_7, %c0_8, %c0_9], %22 {strides = array<i32>} : memref<1x128x128xf32, #tpu.memory_space<vmem>>, vector<1x128x128xf32>,
    %c0_10 = arith.constant 0 : index
    %c0_11 = arith.constant 0 : index
    %c0_12 = arith.constant 0 : index
    %23 = vector.load %arg6[%c0_10, %c0_11, %c0_12] : memref<1x128x128xf32, #tpu.memory_space<vmem>>, vector<1x128x128xf32>
    %24 = vector.shape_cast %23 : vector<1x128x128xf32> to vector<128x128xf32>
    %cst_13 = arith.constant 0.000000e+00 : f32
    %25 = vector.broadcast %cst_13 : f32 to vector<128x128xf32>
    %26 = arith.maximumf %24, %25 : vector<128x128xf32>
    %27 = vector.broadcast %cst_13 : f32 to vector<128x128xf32>
    %28 = arith.subf %24, %27 : vector<128x128xf32>
    %29 = arith.cmpf one, %28, %28 : vector<128x128xf32>
    %30 = vector.broadcast %cst_13 : f32 to vector<128x128xf32>
    %31 = arith.addf %24, %30 : vector<128x128xf32>
    %32 = math.absf %28 : vector<128x128xf32>
    %cst_14 = arith.constant 0.000000e+00 : f32
    %33 = vector.broadcast %cst_14 : f32 to vector<128x128xf32>
    %34 = arith.subf %33, %32 : vector<128x128xf32>
    %35 = math.exp %34 : vector<128x128xf32>
    %36 = math.log1p %35 : vector<128x128xf32>
    %37 = arith.addf %26, %36 : vector<128x128xf32>
    %38 = arith.select %29, %31, %37 : vector<128x128xi1>, vector<128x128xf32>
    %39 = arith.mulf %14, %38 : vector<128x128xf32>
    %c0_15 = arith.constant 0 : index
    %c0_16 = arith.constant 0 : index
    %c0_17 = arith.constant 0 : index
    %40 = vector.load %arg12[%c0_15, %c0_16, %c0_17] : memref<1x128x128xf32, #tpu.memory_space<vmem>>, vector<1x128x128xf32>
    %41 = vector.shape_cast %40 : vector<1x128x128xf32> to vector<128x128xf32>
    %42 = vector.shape_cast %39 : vector<128x128xf32> to vector<1x128x128xf32>
    tpu.vector_store %arg12[%c0_15, %c0_16, %c0_17], %42 {strides = array<i32>} : memref<1x128x128xf32, #tpu.memory_space<vmem>>, vector<1x128x128xf32>,
    %c0_18 = arith.constant 0 : index
    %c0_19 = arith.constant 0 : index
    %43 = vector.load %arg4[%c0_18, %c0_19] : memref<1x128xf32, #tpu.memory_space<vmem>>, vector<1x128xf32>
    %cst_20 = arith.constant 0.000000e+00 : f32
    %44 = vector.broadcast %cst_20 : f32 to vector<1x128xf32>
    %45 = arith.maximumf %43, %44 : vector<1x128xf32>
    %46 = vector.broadcast %cst_20 : f32 to vector<1x128xf32>
    %47 = arith.subf %43, %46 : vector<1x128xf32>
    %48 = arith.cmpf one, %47, %47 : vector<1x128xf32>
    %49 = vector.broadcast %cst_20 : f32 to vector<1x128xf32>
    %50 = arith.addf %43, %49 : vector<1x128xf32>
    %51 = math.absf %47 : vector<1x128xf32>
    %cst_21 = arith.constant 0.000000e+00 : f32
    %52 = vector.broadcast %cst_21 : f32 to vector<1x128xf32>
    %53 = arith.subf %52, %51 : vector<1x128xf32>
    %54 = math.exp %53 : vector<1x128xf32>
    %55 = math.log1p %54 : vector<1x128xf32>
    %56 = arith.addf %45, %55 : vector<1x128xf32>
    %57 = arith.select %48, %50, %56 : vector<1x128xi1>, vector<1x128xf32>
    %c0_22 = arith.constant 0 : index
    %c0_23 = arith.constant 0 : index
    %58 = vector.load %arg3[%c0_22, %c0_23] : memref<1x128xf32, #tpu.memory_space<vmem>>, vector<1x128xf32>
    %c0_24 = arith.constant 0 : index
    %c0_25 = arith.constant 0 : index
    %c0_26 = arith.constant 0 : index
    %59 = vector.load %arg7[%c0_24, %c0_25, %c0_26] : memref<1x1x128xf32, #tpu.memory_space<vmem>>, vector<1x1x128xf32>
    %60 = vector.shape_cast %59 : vector<1x1x128xf32> to vector<1x128xf32>
    %61 = arith.mulf %57, %60 : vector<1x128xf32>
    %62 = arith.addf %58, %61 : vector<1x128xf32>
    %c0_27 = arith.constant 0 : index
    %c0_28 = arith.constant 0 : index
    %c0_29 = arith.constant 0 : index
    %63 = vector.load %arg13[%c0_27, %c0_28, %c0_29] : memref<1x1x128xf32, #tpu.memory_space<vmem>>, vector<1x1x128xf32>
    %64 = vector.shape_cast %63 : vector<1x1x128xf32> to vector<1x128xf32>
    %65 = vector.shape_cast %62 : vector<1x128xf32> to vector<1x1x128xf32>
    tpu.vector_store %arg13[%c0_27, %c0_28, %c0_29], %65 {strides = array<i32>} : memref<1x1x128xf32, #tpu.memory_space<vmem>>, vector<1x1x128xf32>,
    %c0_30 = arith.constant 0 : index
    %c0_31 = arith.constant 0 : index
    %c0_32 = arith.constant 0 : index
    %66 = vector.load %arg8[%c0_30, %c0_31, %c0_32] : memref<1x1x128xf32, #tpu.memory_space<vmem>>, vector<1x1x128xf32>
    %67 = vector.shape_cast %66 : vector<1x1x128xf32> to vector<1x128xf32>
    %cst_33 = arith.constant 0.000000e+00 : f32
    %68 = vector.broadcast %cst_33 : f32 to vector<1x128xf32>
    %69 = arith.maximumf %67, %68 : vector<1x128xf32>
    %70 = vector.broadcast %cst_33 : f32 to vector<1x128xf32>
    %71 = arith.subf %67, %70 : vector<1x128xf32>
    %72 = arith.cmpf one, %71, %71 : vector<1x128xf32>
    %73 = vector.broadcast %cst_33 : f32 to vector<1x128xf32>
    %74 = arith.addf %67, %73 : vector<1x128xf32>
    %75 = math.absf %71 : vector<1x128xf32>
    %cst_34 = arith.constant 0.000000e+00 : f32
    %76 = vector.broadcast %cst_34 : f32 to vector<1x128xf32>
    %77 = arith.subf %76, %75 : vector<1x128xf32>
    %78 = math.exp %77 : vector<1x128xf32>
    %79 = math.log1p %78 : vector<1x128xf32>
    %80 = arith.addf %69, %79 : vector<1x128xf32>
    %81 = arith.select %72, %74, %80 : vector<1x128xi1>, vector<1x128xf32>
    %82 = arith.mulf %57, %81 : vector<1x128xf32>
    %c0_35 = arith.constant 0 : index
    %c0_36 = arith.constant 0 : index
    %c0_37 = arith.constant 0 : index
    %83 = vector.load %arg14[%c0_35, %c0_36, %c0_37] : memref<1x1x128xf32, #tpu.memory_space<vmem>>, vector<1x1x128xf32>
    %84 = vector.shape_cast %83 : vector<1x1x128xf32> to vector<1x128xf32>
    %85 = vector.shape_cast %82 : vector<1x128xf32> to vector<1x1x128xf32>
    tpu.vector_store %arg14[%c0_35, %c0_36, %c0_37], %85 {strides = array<i32>} : memref<1x1x128xf32, #tpu.memory_space<vmem>>, vector<1x1x128xf32>,
    %c0_38 = arith.constant 0 : index
    %c0_39 = arith.constant 0 : index
    %86 = vector.load %arg9[%c0_38, %c0_39] : memref<1x128xf32, #tpu.memory_space<vmem>>, vector<1x128xf32>
    %cst_40 = arith.constant 0.000000e+00 : f32
    %87 = vector.broadcast %cst_40 : f32 to vector<1x128xf32>
    %88 = arith.maximumf %86, %87 : vector<1x128xf32>
    %89 = vector.broadcast %cst_40 : f32 to vector<1x128xf32>
    %90 = arith.subf %86, %89 : vector<1x128xf32>
    %91 = arith.cmpf one, %90, %90 : vector<1x128xf32>
    %92 = vector.broadcast %cst_40 : f32 to vector<1x128xf32>
    %93 = arith.addf %86, %92 : vector<1x128xf32>
    %94 = math.absf %90 : vector<1x128xf32>
    %cst_41 = arith.constant 0.000000e+00 : f32
    %95 = vector.broadcast %cst_41 : f32 to vector<1x128xf32>
    %96 = arith.subf %95, %94 : vector<1x128xf32>
    %97 = math.exp %96 : vector<1x128xf32>
    %98 = math.log1p %97 : vector<1x128xf32>
    %99 = arith.addf %88, %98 : vector<1x128xf32>
    %100 = arith.select %91, %93, %99 : vector<1x128xi1>, vector<1x128xf32>
    %c0_42 = arith.constant 0 : index
    %c0_43 = arith.constant 0 : index
    %101 = vector.load %arg10[%c0_42, %c0_43] : memref<1x128xf32, #tpu.memory_space<vmem>>, vector<1x128xf32>
    %cst_44 = arith.constant 0.000000e+00 : f32
    %102 = vector.broadcast %cst_44 : f32 to vector<1x128xf32>
    %103 = arith.maximumf %101, %102 : vector<1x128xf32>
    %104 = vector.broadcast %cst_44 : f32 to vector<1x128xf32>
    %105 = arith.subf %101, %104 : vector<1x128xf32>
    %106 = arith.cmpf one, %105, %105 : vector<1x128xf32>
    %107 = vector.broadcast %cst_44 : f32 to vector<1x128xf32>
    %108 = arith.addf %101, %107 : vector<1x128xf32>
    %109 = math.absf %105 : vector<1x128xf32>
    %cst_45 = arith.constant 0.000000e+00 : f32
    %110 = vector.broadcast %cst_45 : f32 to vector<1x128xf32>
    %111 = arith.subf %110, %109 : vector<1x128xf32>
    %112 = math.exp %111 : vector<1x128xf32>
    %113 = math.log1p %112 : vector<1x128xf32>
    %114 = arith.addf %103, %113 : vector<1x128xf32>
    %115 = arith.select %106, %108, %114 : vector<1x128xi1>, vector<1x128xf32>
    %116 = arith.mulf %100, %115 : vector<1x128xf32>
    %c0_46 = arith.constant 0 : index
    %c0_47 = arith.constant 0 : index
    %117 = vector.load %arg15[%c0_46, %c0_47] : memref<1x128xf32, #tpu.memory_space<vmem>>, vector<1x128xf32>
    tpu.vector_store %arg15[%c0_46, %c0_47], %116 {strides = array<i32>} : memref<1x128xf32, #tpu.memory_space<vmem>>, vector<1x128xf32>,
    return
  }
  func.func @transform_0(%arg0: i32) -> (i32, i32) {
    %c0_i32 = arith.constant 0 : i32
    %c0_i32_0 = arith.constant 0 : i32
    %c0_i32_1 = arith.constant 0 : i32
    return %c0_i32, %c0_i32_0 : i32, i32
  }
  func.func @transform_1(%arg0: i32) -> (i32, i32) {
    %c0_i32 = arith.constant 0 : i32
    %c0_i32_0 = arith.constant 0 : i32
    %c0_i32_1 = arith.constant 0 : i32
    return %c0_i32, %c0_i32_0 : i32, i32
  }
  func.func @transform_2(%arg0: i32) -> (i32, i32) {
    %c0_i32 = arith.constant 0 : i32
    %c0_i32_0 = arith.constant 0 : i32
    %c0_i32_1 = arith.constant 0 : i32
    return %c0_i32, %c0_i32_0 : i32, i32
  }
  func.func @transform_3(%arg0: i32) -> (i32, i32) {
    %c0_i32 = arith.constant 0 : i32
    %c0_i32_0 = arith.constant 0 : i32
    %c0_i32_1 = arith.constant 0 : i32
    return %c0_i32, %c0_i32_0 : i32, i32
  }
  func.func @transform_4(%arg0: i32) -> (i32, i32, i32) {
    %c0_i32 = arith.constant 0 : i32
    %c0_i32_0 = arith.constant 0 : i32
    %c0_i32_1 = arith.constant 0 : i32
    return %arg0, %c0_i32, %c0_i32_0 : i32, i32, i32
  }
  func.func @transform_5(%arg0: i32) -> (i32, i32, i32) {
    %c0_i32 = arith.constant 0 : i32
    %c0_i32_0 = arith.constant 0 : i32
    %c0_i32_1 = arith.constant 0 : i32
    return %arg0, %c0_i32, %c0_i32_0 : i32, i32, i32
  }
  func.func @transform_6(%arg0: i32) -> (i32, i32, i32) {
    %c0_i32 = arith.constant 0 : i32
    %c0_i32_0 = arith.constant 0 : i32
    %c0_i32_1 = arith.constant 0 : i32
    return %arg0, %c0_i32, %c0_i32_0 : i32, i32, i32
  }
  func.func @transform_7(%arg0: i32) -> (i32, i32, i32) {
    %c0_i32 = arith.constant 0 : i32
    %c0_i32_0 = arith.constant 0 : i32
    %c0_i32_1 = arith.constant 0 : i32
    return %arg0, %c0_i32, %c0_i32_0 : i32, i32, i32
  }
  func.func @transform_8(%arg0: i32) -> (i32, i32) {
    %c0_i32 = arith.constant 0 : i32
    %c0_i32_0 = arith.constant 0 : i32
    %c0_i32_1 = arith.constant 0 : i32
    return %c0_i32, %c0_i32_0 : i32, i32
  }
  func.func @transform_9(%arg0: i32) -> (i32, i32) {
    %c0_i32 = arith.constant 0 : i32
    %c0_i32_0 = arith.constant 0 : i32
    %c0_i32_1 = arith.constant 0 : i32
    return %c0_i32, %c0_i32_0 : i32, i32
  }
  func.func @transform_10(%arg0: i32) -> (i32, i32, i32) {
    %c0_i32 = arith.constant 0 : i32
    %c0_i32_0 = arith.constant 0 : i32
    %c0_i32_1 = arith.constant 0 : i32
    return %arg0, %c0_i32, %c0_i32_0 : i32, i32, i32
  }
  func.func @transform_11(%arg0: i32) -> (i32, i32, i32) {
    %c0_i32 = arith.constant 0 : i32
    %c0_i32_0 = arith.constant 0 : i32
    %c0_i32_1 = arith.constant 0 : i32
    return %arg0, %c0_i32, %c0_i32_0 : i32, i32, i32
  }
  func.func @transform_12(%arg0: i32) -> (i32, i32, i32) {
    %c0_i32 = arith.constant 0 : i32
    %c0_i32_0 = arith.constant 0 : i32
    %c0_i32_1 = arith.constant 0 : i32
    return %arg0, %c0_i32, %c0_i32_0 : i32, i32, i32
  }
  func.func @transform_13(%arg0: i32) -> (i32, i32, i32) {
    %c0_i32 = arith.constant 0 : i32
    %c0_i32_0 = arith.constant 0 : i32
    %c0_i32_1 = arith.constant 0 : i32
    return %arg0, %c0_i32, %c0_i32_0 : i32, i32, i32
  }
  func.func @transform_14(%arg0: i32) -> (i32, i32) {
    %c0_i32 = arith.constant 0 : i32
    %c0_i32_0 = arith.constant 0 : i32
    %c0_i32_1 = arith.constant 0 : i32
    return %c0_i32, %c0_i32_0 : i32, i32
  }
}

</mosaic_0001>

<bundles_post_ra>
// kernel: tpu_custom_call.1
= control target key start
LH: loop header
LB: loop body
LE: loop exit
PB: predicated region body
PF: predicated region fallthrough
CT: control target
= control target key end

     0   :  { %s3673_s0 = inlined_call_operand.hbm [shape: f32[128,128], index: 0, kind: input, shape index: {}]   ;;  %s3674_s1 = inlined_call_operand.hbm [shape: f32[128,128], index: 1, kind: input, shape index: {}]   ;;  %s3675_s2 = inlined_call_operand.vmem [shape: f32[1,128], index: 2, kind: input, shape index: {}]   ;;  %s3676_s3 = inlined_call_operand.vmem [shape: f32[1,128], index: 3, kind: input, shape index: {}]   ;;  %s3677_s4 = inlined_call_operand.hbm [shape: f32[3,128,128], index: 4, kind: input, shape index: {}]   ;;  %s3678_s5 = inlined_call_operand.hbm [shape: f32[3,128,128], index: 5, kind: input, shape index: {}]   ;;  %s3679_s6 = inlined_call_operand.vmem [shape: f32[3,1,128], index: 6, kind: input, shape index: {}]   ;;  %s3680_s7 = inlined_call_operand.vmem [shape: f32[3,1,128], index: 7, kind: input, shape index: {}]   ;;  %s3681_s8 = inlined_call_operand.vmem [shape: f32[1,128], index: 8, kind: input, shape index: {}]   ;;  %s3682_s9 = inlined_call_operand.vmem [shape: f32[1,128], index: 9, kind: input, shape index: {}]   ;;  %s3683_s10 = inlined_call_operand.hbm [shape: f32[3,128,128], index: 10, kind: output, shape index: {0}]   ;;  %s3684_s11 = inlined_call_operand.hbm [shape: f32[3,128,128], index: 11, kind: output, shape index: {1}]   ;;  %s3685_s12 = inlined_call_operand.hbm [shape: f32[3,1,128], index: 12, kind: output, shape index: {2}]   ;;  %s3686_s13 = inlined_call_operand.hbm [shape: f32[3,1,128], index: 13, kind: output, shape index: {3}]   ;;  %s3687_s14 = inlined_call_operand.hbm [shape: f32[1,128], index: 14, kind: output, shape index: {4}]  }
   0x1   :  { %3715 = sst [smem:[#allocation29_spill]] %s3673_s0 }
   0x2   :  { %3716 = sst [smem:[#allocation30_spill]] %s3675_s2 }
   0x3   :  { %3717 = sst [smem:[#allocation31_spill]] %s3677_s4 }
   0x4   :  { %3718 = sst [smem:[#allocation32_spill]] %s3683_s10 }
   0x5   :  { %3719 = sst [smem:[#allocation33_spill]] %s3684_s11 }
   0x6   :  { %3720 = sst [smem:[#allocation34_spill]] %s3685_s12 }
   0x7   :  { %3721 = sst [smem:[#allocation35_spill]] %s3686_s13 }
   0x8   :  { %3722 = sst [smem:[#allocation36_spill]] %s3687_s14 }
   0x9   :  { %20 = vsyncpa [#allocation3], 0 }
   0xa   :  { %21 = vsyncpa [#allocation6], 0 }
   0xb   :  { %22 = vsyncpa [#allocation4], 0 }
   0xc   :  { %24 = vsyncpa [#allocation4 + $0x1], 0 }
   0xd   :  { %25 = vsyncpa [#allocation11], 0 }
   0xe   :  { %27 = vsyncpa [#allocation11 + $0x1], 0 }
   0xf   :  { %28 = vsyncpa [#allocation14], 0 }
  0x10   :  { %30 = vsyncpa [#allocation14 + $0x1], 0  ;;  %s2389_s29 = smov 0   ;;  %s2391_s30 = smov 0  }
  0x11   :  { %s2393_s15 = smov 0   ;;  %s2395_s16 = smov 0  }
  0x12 LB: > { %3723 = sst [smem:[#allocation23_spill]] %s2287_s29  ;;  %s2410_s17 = sadd.s32 4294967295, %s2299_s16   ;;  %s2299_s16 = sphi %s2395_s16, %s3838_s16   ;;  %s2295_s15 = sphi %s2393_s15, %s3840_s15   ;;  %s2291_s30 = sphi %s2391_s30, %s3842_s30   ;;  %s2287_s29 = sphi %s2389_s29, %s3841_s29  }
  0x13   : > { %3724 = sst [smem:[#allocation24_spill]] %s2295_s15  ;;  %s3688_s18 = sadd.s32 4294967294, %s2299_s16  }
  0x14   : > { %s2414_s19 = sadd.s32 1, %s2299_s16   ;;  %s127_s20 = sadd.s32 1, %s2295_s15 }
  0x15   : > { %3725 = sst [smem:[#allocation25_spill]] %s2414_s19  ;;  %s124_s21 = ssub.s32 %s2299_s16, %s2414_s19 }
  0x16   : > { %p134_p0 = scmp.ne.s32.totalorder %s2295_s15, %s2291_s30  ;;  %p125_p1 = scmp.eq.s32.totalorder %s124_s21, 0 }
  0x17   : > { %p135_p2 = scmp.eq.s32.totalorder %s2299_s16, 0  ;;  %p140_p3 = scmp.ne.s32.totalorder %s2291_s30, %s2287_s29 }
  0x18   : > { %p3697_p4 = scmp.eq.s32.totalorder %s2410_s17, 0  ;;  %p3695_p7 = scmp.eq.s32.totalorder %s2410_s17, 2 }
  0x19   : > { %s2426_s22 = scalar_select %p125_p1, %s2295_s15, %s127_s20  }
  0x1a   : > { %p2428_p5 = por %p135_p2, %p134_p0  ;;  %p2434_p6 = por %p3697_p4, %p140_p3 }
  0x1b   : > { %3726 = sst [smem:[#allocation26_spill]] %s2426_s22  ;;  %p290_p8 = scmp.eq.s32.totalorder %s3688_s18, 2 }
  0x1c   : > { %s3727_s23 = scalar_select %p2428_p5, 1, 0 }
  0x1d   : > { %s3728_s24 = scalar_select %p2434_p6, 1, 0 }
  0x1e   : > { %p1712_p9 = scmp.ge.s32.totalorder %s2299_s16, 1  ;;  %p396_p10 = scmp.lt.s32.totalorder %s2299_s16, 4 }
  0x1f   : > { %p2445_p11 = por %p3695_p7, %p134_p0  ;;  %p2449_p12 = por %p290_p8, %p140_p3 }
  0x20   : > { %p2453_p13 = pnand %p1712_p9, %p396_p10  ;;  %s2301_s28 = smov [#allocation2]  }
  0x21   : > { %s3729_s25 = scalar_select %p2445_p11, 1, 0 }
  0x22   : > { %s3731_s26 = scalar_select %p2449_p12, 1, 0 }
  0x23   : > { %3730 = sst [smem:[#allocation27_spill]] %s3729_s25  ;;  %p1769_p1 = pneg %p2453_p13 }
  0x24   : > { %3732 = sst [smem:[#allocation28_spill]] %s3731_s26  ;;  %s408_s20 = sshll.u32 %s2301_s28, 4  ;;  %s409_s20 = int_to_ptr.vmem [resolvable:$true] %s408_s20 }
  0x25   : > { %s3733_s27 = scalar_select %p2453_p13, 1, 0 }
  0x26   : > { %p2461_p2 = pnand %p1769_p1, %p3697_p4  ;;  %s447_s18 = sand.u32 1, %s2299_s16  }
  0x27   : > { %s3735_s0 = sld [smem:[#allocation29_spill]] }
  0x28   : > { %p3707_p8 = pneg %p2461_p2 }
  0x2d   : > { %s1987_s26 = scalar_lea.hbm %s3735_s0, 2048 }
  0x2e   : > { %p1988_p3 = scmp.ne.s32.totalorder %s3735_s0, %s1987_s26  ;;  %p1994_p1 = scmp.lt.u32.totalorder %s1987_s26, %s3735_s0 }
  0x30   : > { %p1990_p9 = pnand %p3707_p8, %p1988_p3 }
  0x32   : > { %p1991_p10 = pneg %p1990_p9 }
  0x34   : > { %p1996_p7 = pnand %p1994_p1, %p1991_p10 }
  0x36   : > { %1999 = shalt.err (!%p1996_p7)
}
  0x37   : > { %s2000_s12 = scalar_lea.vmem %s409_s20, 2048  ;;  %p2008_p11 = scmp.lt.s32.totalorder %s409_s20, %s409_s20 }
  0x38   : > { %p2001_p4 = scmp.ne.s32.totalorder %s409_s20, %s2000_s12  ;;  %p2009_p6 = scmp.lt.s32.totalorder %s2000_s12, %s2000_s12 }
  0x3a   : > { %p2003_p0 = pnand %p2001_p4, %p3707_p8  ;;  %p2010_p13 = por %p2009_p6, %p2008_p11 }
  0x3c   : > { %p2004_p12 = pneg %p2003_p0 }
  0x3e   : > { %p2011_p5 = pnand %p2010_p13, %p2004_p12 }
  0x40   : > { %2014 = shalt.err (!%p2011_p5)
}
  0x41   : > { %s3705_s14 = smov 128   ;;  %s2303_s13 = smov 8  }
  0x42   : > { %1772 = dma.hbm_to_vmem [thread:$0]  (!%p2461_p2), %s3735_s0, 2048, %s409_s20, [#allocation3], %s3705_s14, %s3705_s14, %s2303_s13  }
  0x43   : > { %p3736_p4 = scmp.ne.s32.totalorder %s3727_s23, 0  ;;  %p3737_p6 = scmp.lt.s32.totalorder %s2299_s16, 3 }
  0x44   : > { %s449_s22 = sand.u32 1, %s2295_s15   ;;  %s3704_s28 = sshll.u32 %s2299_s16, 11 }
  0x45   : > { %p2496_p7 = pnand %p3737_p6, %p3736_p4  ;;  %s2501_s26 = sshll.u32 %s449_s22, 7 }
  0x46   : > { %s3739_s4 = sld [smem:[#allocation31_spill]]  ;;  %s451_s23 = scalar_lea.vmem [#allocation7], %s2501_s26 }
  0x47   : > { %s3738_s12 = scalar_select %p2496_p7, 1, 0 }
  0x48   : > { %s458_s20 = sshll.u32 %s451_s23, 4  ;;  %s2514_s29 = scalar_lea.sflag [#allocation3], %s447_s18  ;;  %s2512_s20 = int_to_ptr.vmem [resolvable:$true] %s458_s20 }
  0x49   : > { %p3710_p11 = pneg %p2496_p7 }
  0x4c   : > { %s2509_s25 = scalar_lea.hbm %s3739_s4, %s3704_s28  ;;  %s2020_s22 = scalar_lea.hbm %s3739_s4, 6144 }
  0x4d   : > { %s2015_s19 = scalar_lea.hbm %s2509_s25, 2048  ;;  %p2021_p0 = scmp.lt.u32.totalorder %s2509_s25, %s3739_s4 }
  0x4e   : > { %p2016_p5 = scmp.ne.s32.totalorder %s2509_s25, %s2015_s19  ;;  %p2022_p3 = scmp.lt.u32.totalorder %s2020_s22, %s2015_s19 }
  0x4f   : > { %p2024_p10 = scmp.lt.u32.totalorder %s2015_s19, %s2509_s25 }
  0x50   : > { %p2018_p12 = pnand %p3710_p11, %p2016_p5  ;;  %p2023_p9 = por %p2022_p3, %p2021_p0 }
  0x52   : > { %p2019_p13 = pneg %p2018_p12  ;;  %p2025_p1 = por %p2024_p10, %p2023_p9 }
  0x54   : > { %p2026_p4 = pnand %p2025_p1, %p2019_p13 }
  0x56   : > { %2029 = shalt.err (!%p2026_p4)
}
  0x57   : > { %s2030_s18 = scalar_lea.vmem %s2512_s20, 2048  ;;  %s2304_s23 = smov [#allocation7]  }
  0x58   : > { %p2031_p6 = scmp.ne.s32.totalorder %s2512_s20, %s2030_s18  ;;  %s2035_s2 = sshll.u32 %s2304_s23, 4  ;;  %s2036_s2 = int_to_ptr.vmem [resolvable:$false] %s2035_s2 }
  0x59   : > { %s2037_s14 = scalar_lea.vmem %s2036_s2, 4096  ;;  %p2038_p8 = scmp.lt.s32.totalorder %s2512_s20, %s2036_s2 }
  0x5a   : > { %p2033_p5 = pnand %p2031_p6, %p3710_p11  ;;  %p2039_p0 = scmp.lt.s32.totalorder %s2037_s14, %s2030_s18 }
  0x5c   : > { %p2034_p12 = pneg %p2033_p5  ;;  %p2040_p3 = por %p2039_p0, %p2038_p8 }
  0x5e   : > { %p2041_p9 = pnand %p2040_p3, %p2034_p12 }
  0x60   : > { %2044 = shalt.err (!%p2041_p9)
}
  0x61   : > { %s3740_s28 = smov 128   ;;  %s2305_s19 = smov [#allocation5]  }
  0x62   : > { %1779 = dma.hbm_to_vmem [thread:$0]  (!%p2496_p7), %s2509_s25, 2048, %s2512_s20, %s2514_s29, %s3740_s28, %s3740_s28, %s2303_s13  }
  0x63   : > { %s421_s11 = sshll.u32 %s2305_s19, 4  ;;  %s3741_s22 = sshll.u32 %s2299_s16, 11  ;;  %s422_s11 = int_to_ptr.vmem [resolvable:$true] %s421_s11 }
  0x64   : > { %s2550_s2 = scalar_lea.hbm %s3678_s5, %s3741_s22  ;;  %s2045_s4 = scalar_lea.hbm %s3674_s1, 2048 }
  0x65   : > { %p2046_p8 = scmp.ne.s32.totalorder %s3674_s1, %s2045_s4  ;;  %p3742_p13 = pneg %p2461_p2 }
  0x66   : > { %p2052_p4 = scmp.lt.u32.totalorder %s2045_s4, %s3674_s1 }
  0x67   : > { %p2048_p10 = pnand %p2046_p8, %p3742_p13 }
  0x69   : > { %p2049_p1 = pneg %p2048_p10 }
  0x6b   : > { %p2054_p6 = pnand %p2052_p4, %p2049_p1 }
  0x6d   : > { %2057 = shalt.err (!%p2054_p6)
}
  0x6e   : > { %s2058_s19 = scalar_lea.vmem %s422_s11, 2048  ;;  %p3743_p12 = pmov %p3742_p13 }
  0x6f   : > { %p2059_p5 = scmp.ne.s32.totalorder %s422_s11, %s2058_s19  ;;  %p2066_p9 = scmp.lt.s32.totalorder %s422_s11, %s422_s11 }
  0x70   : > { %p2067_p11 = scmp.lt.s32.totalorder %s2058_s19, %s2058_s19 }
  0x71   : > { %p2061_p0 = pnand %p2059_p5, %p3743_p12 }
  0x72   : > { %p2068_p7 = por %p2067_p11, %p2066_p9 }
  0x73   : > { %p2062_p3 = pneg %p2061_p0 }
  0x75   : > { %p2069_p8 = pnand %p2068_p7, %p2062_p3 }
  0x77   : > { %2072 = shalt.err (!%p2069_p8)
}
  0x78   : > { %1775 = dma.hbm_to_vmem [thread:$0]  (!%p2461_p2), %s3674_s1, 2048, %s422_s11, [#allocation6], %s3740_s28, %s3740_s28, %s2303_s13  }
  0x79   : > { %s472_s10 = scalar_lea.vmem [#allocation8], %s2501_s26  ;;  %s2073_s22 = scalar_lea.hbm %s2550_s2, 2048 }
  0x7a   : > { %s479_s15 = sshll.u32 %s472_s10, 4  ;;  %p2074_p7 = scmp.ne.s32.totalorder %s2550_s2, %s2073_s22  ;;  %s2576_s15 = int_to_ptr.vmem [resolvable:$true] %s479_s15 }
  0x7b   : > { %p3744_p11 = scmp.ne.s32.totalorder %s3738_s12, 0  ;;  %s2078_s18 = scalar_lea.hbm %s3678_s5, 6144 }
  0x7c   : > { %p2079_p4 = scmp.lt.u32.totalorder %s2550_s2, %s3678_s5  ;;  %p2080_p6 = scmp.lt.u32.totalorder %s2078_s18, %s2073_s22 }
  0x7d   : > { %p3745_p13 = pneg %p3744_p11  ;;  %p2082_p5 = scmp.lt.u32.totalorder %s2073_s22, %s2550_s2 }
  0x7e   : > { %p2081_p2 = por %p2080_p6, %p2079_p4 }
  0x7f   : > { %p2076_p10 = pnand %p2074_p7, %p3745_p13 }
  0x80   : > { %p2083_p12 = por %p2082_p5, %p2081_p2 }
  0x81   : > { %p2077_p1 = pneg %p2076_p10 }
  0x83   : > { %p2084_p0 = pnand %p2083_p12, %p2077_p1 }
  0x85   : > { %2087 = shalt.err (!%p2084_p0)
}
  0x86   : > { %s2088_s26 = scalar_lea.vmem %s2576_s15, 2048  ;;  %p3746_p9 = pmov %p3745_p13 }
  0x87   : > { %p2089_p3 = scmp.ne.s32.totalorder %s2576_s15, %s2088_s26  ;;  %s2306_s11 = smov [#allocation8]  }
  0x88   : > { %s2093_s20 = sshll.u32 %s2306_s11, 4  ;;  %s2094_s20 = int_to_ptr.vmem [resolvable:$false] %s2093_s20 }
  0x89   : > { %p2091_p8 = pnand %p2089_p3, %p3746_p9  ;;  %s2095_s19 = scalar_lea.vmem %s2094_s20, 4096 }
  0x8a   : > { %p2096_p13 = scmp.lt.s32.totalorder %s2576_s15, %s2094_s20  ;;  %p2097_p10 = scmp.lt.s32.totalorder %s2095_s19, %s2088_s26 }
  0x8b   : > { %p2092_p7 = pneg %p2091_p8 }
  0x8c   : > { %p2098_p4 = por %p2097_p10, %p2096_p13 }
  0x8e   : > { %p2099_p6 = pnand %p2098_p4, %p2092_p7 }
  0x90   : > { %2102 = shalt.err (!%p2099_p6)
}
  0x91   : > { %1782 = dma.hbm_to_vmem [thread:$0]  (!%p3744_p11), %s2550_s2, 2048, %s2576_s15, %s2514_s29, %s3740_s28, %s3740_s28, %s2303_s13  }
  0x92   : > { %p3747_p1 = scmp.ne.s32.totalorder %s3733_s27, 0 }
  0x93   : > { %p3748_p2 = scmp.eq.s32.totalorder (!%p3747_p1), %s2410_s17, 0 }
  0x94   : > { %503 = sbr.rel (%p3747_p1) target bundleno = 456 (0x1c8), region = 60 }
  0x9b   : > { %2258 = dma.done.wait (%p3748_p2), [#allocation3], 2048   ;;  %p3749_p5 = pmov %p3748_p2 }
  0x9c   : > { %p3750_p12 = pmov %p3748_p2 }
  0x9d   : > { %2260 = vsyncadd (%p3749_p5), [#allocation3], 4294965248 }
  0x9e   : > { %2262 = dma.done.wait (%p3750_p12), [#allocation6], 2048   ;;  %p3751_p0 = pmov %p3748_p2 }
  0x9f   : > { %s2616_s12 = sand.u32 1, %s2410_s17   ;;  %s2619_s27 = sand.u32 1, %s2291_s30  }
  0xa0   : > { %2264 = vsyncadd (%p3751_p0), [#allocation6], 4294965248  ;;  %s2622_s13 = sshll.u32 %s2619_s27, 7  ;;  %s514_s29 = scalar_lea.sflag [#allocation3], %s2616_s12 }
  0xa1   : > { %s2626_s28 = scalar_lea.vmem [#allocation7], %s2622_s13  ;;  %p3752_p11 = scmp.ne.s32.totalorder %s3728_s24, 0 }
  0xa3   : > { %2266 = dma.done.wait (%p3752_p11), %s514_s29, 4096  }
  0xa4   : > { %2268 = vsyncadd (%p3752_p11), %s514_s29, 4294963200  ;;  %v2632_v0 = vld [vmem:[#allocation5] sm:$0xff]  ;;  %s2635_s2 = scalar_lea.vmem [#allocation8], %s2622_s13  ;;  %v2640_v2 = vld [vmem:[#allocation5 + $0x8] sm:$0xff]  ;;  %s2788_s24 = scalar_lea.vmem [#allocation10], %s2622_s13 }
  0xa5   : > { %v2638_v1 = vld [vmem:[%s2635_s2] sm:$0xff]  ;;  %v665_v3 = vand.u32 2147483647, %v2632_v0  ;;  %v2644_v4 = vld [vmem:[%s2635_s2 + $0x8] sm:$0xff]  ;;  %v2647_v6 = vld [vmem:[#allocation5 + $0x10] sm:$0xff]  ;;  %v617_v32 = vmax.f32 %v2632_v0, 0.0  ;;  %vm633_vm2 = vcmp.ne.f32.partialorder %v2632_v0, %v2632_v0  ;;  %vm634_vm5 = vcmp.ne.f32.partialorder %v2640_v2, %v2640_v2 }
  0xa6   : > { %v1049_v5 = vand.u32 2147483647, %v2638_v1  ;;  %v666_v8 = vand.u32 2147483647, %v2640_v2  ;;  %v2651_v9 = vld [vmem:[%s2635_s2 + $0x10] sm:$0xff]  ;;  %v2656_v18 = vld [vmem:[#allocation5 + $0x18] sm:$0xff]  ;;  %vm1017_vm4 = vcmp.ne.f32.partialorder %v2638_v1, %v2638_v1  ;;  %vm1018_vm7 = vcmp.ne.f32.partialorder %v2644_v4, %v2644_v4 }
  0xa7   : > { %v681_v7 = vsub.f32 0.0, %v665_v3  ;;  %v1050_v11 = vand.u32 2147483647, %v2644_v4  ;;  %v667_v14 = vand.u32 2147483647, %v2647_v6  ;;  %v2659_v21 = vld [vmem:[%s2635_s2 + $0x18] sm:$0xff]  ;;  %vm635_vm9 = vcmp.ne.f32.partialorder %v2647_v6, %v2647_v6 }
  0xa8   : > { %v1065_v10 = vsub.f32 0.0, %v1049_v5  ;;  %v682_v13 = vsub.f32 0.0, %v666_v8  ;;  %v1051_v17 = vand.u32 2147483647, %v2651_v9  ;;  %v668_v25 = vand.u32 2147483647, %v2656_v18 }
  0xa9   : > { %v697_v12 = vmul.f32 1.442695, %v681_v7  ;;  %v1066_v16 = vsub.f32 0.0, %v1050_v11  ;;  %v683_v20 = vsub.f32 0.0, %v667_v14  ;;  %v2662_v26 = vld [vmem:[#allocation5 + $0x20] sm:$0xff]  ;;  %v2668_v31 = vld [vmem:[#allocation5 + $0x28] sm:$0xff]  ;;  %vm1019_vm12 = vcmp.ne.f32.partialorder %v2651_v9, %v2651_v9 }
  0xaa   : > { %v1081_v15 = vmul.f32 1.442695, %v1065_v10  ;;  %v699_v19 = vmul.f32 1.442695, %v682_v13  ;;  %v1067_v23 = vsub.f32 0.0, %v1051_v17  ;;  %v2666_v29 = vld [vmem:[%s2635_s2 + $0x20] sm:$0xff]  ;;  %vm636_vm13 = vcmp.ne.f32.partialorder %v2656_v18, %v2656_v18 }
  0xab   : > { %1843 = vpow2.f32 %v697_v12  ;;  %v1083_v22 = vmul.f32 1.442695, %v1066_v16  ;;  %v701_v24 = vmul.f32 1.442695, %v683_v20  ;;  %v1052_v28 = vand.u32 2147483647, %v2659_v21 }
  0xac   : > { %1845 = vpow2.f32 %v1081_v15  ;;  %v1085_v27 = vmul.f32 1.442695, %v1067_v23  ;;  %v684_v30 = vsub.f32 0.0, %v668_v25  ;;  %v669_v34 = vand.u32 2147483647, %v2662_v26  ;;  %v2685_v53 = vld [vmem:[%s2635_s2 + $0x28] sm:$0xff] }
  0xad   : > { %1847 = vpow2.f32 %v699_v19  ;;  %v1068_v33 = vsub.f32 0.0, %v1052_v28  ;;  %v1001_v35 = vmax.f32 %v2638_v1, 0.0  ;;  %v1053_v37 = vand.u32 2147483647, %v2666_v29  ;;  %v2687_v58 = vld [vmem:[#allocation5 + $0x30] sm:$0xff]  ;;  %v2851_v13 = vld [vmem:[%s2635_s2 + $0x38] sm:$0xff] }
  0xae   : > { %1849 = vpow2.f32 %v1083_v22  ;;  %v703_v36 = vmul.f32 1.442695, %v684_v30  ;;  %v618_v38 = vmax.f32 %v2640_v2, 0.0  ;;  %v685_v40 = vsub.f32 0.0, %v669_v34  ;;  %p595_p3 = scmp.lt.s32.totalorder %s2410_s17, 2  ;;  %s3298_s23 = scalar_lea.vmem [#allocation9], %s2622_s13 }
  0xaf   : > { %1851 = vpow2.f32 %v701_v24  ;;  %v1087_v39 = vmul.f32 1.442695, %v1068_v33  ;;  %v670_v41 = vand.u32 2147483647, %v2668_v31  ;;  %v1002_v42 = vmax.f32 %v2644_v4, 0.0  ;;  %s1743_s11 = sshll.u32 %s2410_s17, 11 }
  0xb0   : > { %1853 = vpow2.f32 %v1085_v27  ;;  %v619_v43 = vmax.f32 %v2647_v6, 0.0  ;;  %v1069_v44 = vsub.f32 0.0, %v1053_v37  ;;  %v1003_v45 = vmax.f32 %v2651_v9, 0.0  ;;  %s3176_s0 = scalar_select %p595_p3, %s2410_s17, 2 }
  0xb1   : > { %1855 = vpow2.f32 %v703_v36  ;;  %v620_v46 = vmax.f32 %v2656_v18, 0.0  ;;  %v705_v47 = vmul.f32 1.442695, %v685_v40  ;;  %v1004_v49 = vmax.f32 %v2659_v21, 0.0  ;;  %s1433_s29 = sshll.u32 %s3298_s23, 4  ;;  %s3817_s4 = sld [smem:[#allocation32_spill]]  ;;  %s3443_s29 = int_to_ptr.vmem [resolvable:$true] %s1433_s29 }
  0xb2   : > { %1857 = vpow2.f32 %v1087_v39  ;;  %v621_v50 = vmax.f32 %v2662_v26, 0.0  ;;  %v1089_v51 = vmul.f32 1.442695, %v1069_v44  ;;  %v2682_v52 = vsub.f32 0.0, %v670_v41  ;;  %s600_s15 = scalar_lea.vmem %s3680_s7, %s3176_s0  ;;  %s597_s13 = scalar_lea.vmem %s3679_s6, %s3176_s0 }
  0xb3   : > { %1859 = vpow2.f32 %v705_v47  ;;  %v1054_v7 = vand.u32 2147483647, %v2685_v53  ;;  %v671_v12 = vand.u32 2147483647, %v2687_v58  ;;  %vm1020_vm15 = vcmp.ne.f32.partialorder %v2659_v21, %v2659_v21  ;;  %s3819_s18 = sld [smem:[#allocation33_spill]]  ;;  %s2103_s25 = scalar_lea.vmem %s3443_s29, 2048 }
  0xb4   : > { %1861 = vpow2.f32 %v1089_v51  ;;  %p2104_p9 = scmp.ne.s32.totalorder %s3443_s29, %s2103_s25  ;;  %s2307_s26 = smov [#allocation9]  }
  0xb5   : > { %v1844_v48 = vpop.eup %1843 }
  0xb6   : > { %v1846_v54 = vpop.eup %1845  ;;  %v729_v55 = vadd.f32 1.0, %v1844_v48  ;;  %v732_v56 = vmul.f32 -0.5, %v1844_v48  ;;  %v735_v57 = vand.u32 2147483647, %v1844_v48 }
  0xb7   : > { %v1848_v59 = vpop.eup %1847  ;;  %v1113_v60 = vadd.f32 1.0, %v1846_v54  ;;  %v1116_v61 = vmul.f32 -0.5, %v1846_v54  ;;  %v1119_v62 = vand.u32 2147483647, %v1846_v54  ;;  %s3441_s10 = scalar_lea.hbm %s3817_s4, %s1743_s11 }
  0xb8   : > { %v1850_v63 = vpop.eup %1849  ;;  %1863 = vlog2.f32 %v729_v55  ;;  %v733_v3 = vadd.f32 1.0, %v732_v56  ;;  %v738_v5 = vadd.f32 1.0, %v1848_v59  ;;  %v741_v11 = vmul.f32 -0.5, %v1848_v59 }
  0xb9   : > { %v1852_v8 = vpop.eup %1851  ;;  %1865 = vlog2.f32 %v1113_v60  ;;  %v1117_v10 = vadd.f32 1.0, %v1116_v61  ;;  %vm2691_vm0 = vcmp.lt.f32.partialorder %v735_v57, 0.0004427343  ;;  %v744_v14 = vand.u32 2147483647, %v1848_v59  ;;  %s3463_s14 = scalar_lea.hbm %s3819_s18, %s1743_s11  ;;  %s2107_s11 = sshll.u32 %s2307_s26, 4  ;;  %s2108_s11 = int_to_ptr.vmem [resolvable:$false] %s2107_s11 }
  0xba   : > { %1867 = vlog2.f32 %v738_v5  ;;  %v1122_v15 = vadd.f32 1.0, %v1850_v63  ;;  %v1854_v16 = vpop.eup %1853  ;;  %vm2695_vm1 = vcmp.lt.f32.partialorder %v1119_v62, 0.0004427343  ;;  %v742_v19 = vadd.f32 1.0, %v741_v11  ;;  %s2109_s20 = scalar_lea.vmem %s2108_s11, 4096  ;;  %p2110_p10 = scmp.lt.s32.totalorder %s3443_s29, %s2108_s11 }
  0xbb   : > { %v1125_v20 = vmul.f32 -0.5, %v1850_v63  ;;  %v1128_v22 = vand.u32 2147483647, %v1850_v63  ;;  %v734_v23 = vmul.f32 %v1844_v48, %v733_v3  ;;  %v747_v24 = vadd.f32 1.0, %v1852_v8  ;;  %v1856_v27 = vpop.eup %1855  ;;  %p2111_p4 = scmp.lt.s32.totalorder %s2109_s20, %s2103_s25 }
  0xbc   : > { %1869 = vlog2.f32 %v1122_v15  ;;  %v750_v25 = vmul.f32 -0.5, %v1852_v8  ;;  %v1118_v28 = vmul.f32 %v1846_v54, %v1117_v10  ;;  %vm2701_vm3 = vcmp.lt.f32.partialorder %v744_v14, 0.0004427343  ;;  %v1858_v36 = vpop.eup %1857 }
  0xbd   : > { %v1126_v33 = vadd.f32 1.0, %v1125_v20  ;;  %v753_v34 = vand.u32 2147483647, %v1852_v8  ;;  %1871 = vlog2.f32 %v747_v24  ;;  %v1131_v39 = vadd.f32 1.0, %v1854_v16  ;;  %v2713_v51 = vpop.eup %1859  ;;  %p2112_p6 = por %p2111_p4, %p2110_p10 }
  0xbe   : > { %v751_v37 = vadd.f32 1.0, %v750_v25  ;;  %v1134_v40 = vmul.f32 -0.5, %v1854_v16  ;;  %v743_v41 = vmul.f32 %v1848_v59, %v742_v19  ;;  %vm2709_vm6 = vcmp.lt.f32.partialorder %v1128_v22, 0.0004427343  ;;  %v2715_v57 = vpop.eup %1861 }
  0xbf   : > { %v1137_v47 = vand.u32 2147483647, %v1854_v16  ;;  %v756_v48 = vadd.f32 1.0, %v1856_v27  ;;  %v1127_v54 = vmul.f32 %v1850_v63, %v1126_v33  ;;  %1873 = vlog2.f32 %v1131_v39 }
  0xc0   : > { %v1135_v55 = vadd.f32 1.0, %v1134_v40  ;;  %v759_v56 = vmul.f32 -0.5, %v1856_v27  ;;  %vm2719_vm8 = vcmp.lt.f32.partialorder %v753_v34, 0.0004427343  ;;  %v762_v59 = vand.u32 2147483647, %v1856_v27 }
  0xc1   : > { %1875 = vlog2.f32 %v756_v48  ;;  %v1140_v61 = vadd.f32 1.0, %v1858_v36  ;;  %v752_v3 = vmul.f32 %v1852_v8, %v751_v37  ;;  %v1143_v10 = vmul.f32 -0.5, %v1858_v36 }
  0xc2   : > { %v1864_v62 = vpop.eup %1863  ;;  %v760_v5 = vadd.f32 1.0, %v759_v56  ;;  %v1146_v63 = vand.u32 2147483647, %v1858_v36  ;;  %vm2725_vm10 = vcmp.lt.f32.partialorder %v1137_v47, 0.0004427343  ;;  %v765_v19 = vadd.f32 1.0, %v2713_v51 }
  0xc3   : > { %v1866_v11 = vpop.eup %1865  ;;  %v731_v14 = vmul.f32 0.6931472, %v1864_v62  ;;  %1877 = vlog2.f32 %v1140_v61  ;;  %v1136_v24 = vmul.f32 %v1854_v16, %v1135_v55  ;;  %vm2730_vm11 = vcmp.lt.f32.partialorder %v762_v59, 0.0004427343 }
  0xc4   : > { %v1868_v20 = vpop.eup %1867  ;;  %v1115_v22 = vmul.f32 0.6931472, %v1866_v11  ;;  %v1144_v25 = vadd.f32 1.0, %v1143_v10  ;;  %1879 = vlog2.f32 %v765_v19  ;;  %v768_v37 = vmul.f32 -0.5, %v2713_v51 }
  0xc5   : > { %v737_v33 = vsel %vm2691_vm0, %v734_v23, %v731_v14  ;;  %v740_v34 = vmul.f32 0.6931472, %v1868_v20  ;;  %v761_v47 = vmul.f32 %v1856_v27, %v760_v5  ;;  %vm2745_vm14 = vcmp.lt.f32.partialorder %v1146_v63, 0.0004427343 }
  0xc6   : > { %v1870_v39 = vpop.eup %1869  ;;  %v873_v40 = vadd.f32 %v737_v33, %v617_v32  ;;  %v1121_v16 = vsel %vm2695_vm1, %v1118_v28, %v1115_v22  ;;  %v771_v32 = vand.u32 2147483647, %v2713_v51  ;;  %v1149_v28 = vadd.f32 1.0, %v2715_v57 }
  0xc7   : > { %v1257_v23 = vadd.f32 %v1121_v16, %v1001_v35  ;;  %v746_v48 = vsel %vm2701_vm3, %v743_v41, %v740_v34  ;;  %v1124_v55 = vmul.f32 0.6931472, %v1870_v39  ;;  %v1872_v56 = vpop.eup %1871  ;;  %v1145_v35 = vmul.f32 %v1858_v36, %v1144_v25  ;;  %v2841_v16 = vld [vmem:[#allocation5 + $0x38] sm:$0xff] }
  0xc8   : > { %v2758_v17 = vsel %vm633_vm2, %v2632_v0, %v873_v40  ;;  %v874_v27 = vadd.f32 %v746_v48, %v618_v38  ;;  %v749_v0 = vmul.f32 0.6931472, %v1872_v56  ;;  %v769_v59 = vadd.f32 1.0, %v768_v37  ;;  %v2859_v56 = vld [vmem:[#allocation5 + $0x40] sm:$0xff] }
  0xc9   : > { %v1273_v30 = vsel %vm1017_vm4, %v2638_v1, %v1257_v23  ;;  %v1130_v41 = vsel %vm2709_vm6, %v1127_v54, %v1124_v55  ;;  %v1874_v61 = vpop.eup %1873  ;;  %1881 = vlog2.f32 %v1149_v28  ;;  %vm2782_vm0 = vcmp.lt.f32.partialorder %v771_v32, 0.0004427343 }
  0xca   : > { %v1289_v38 = vmul.f32 %v1273_v30, %v2758_v17  ;;  %v2776_v36 = vsel %vm634_vm5, %v2640_v2, %v874_v27  ;;  %v1258_v62 = vadd.f32 %v1130_v41, %v1002_v42  ;;  %v755_v1 = vsel %vm2719_vm8, %v752_v3, %v749_v0 }
  0xcb   : > { %v1876_v5 = vpop.eup %1875  ;;  %v1133_v44 = vmul.f32 0.6931472, %v1874_v61  ;;  %v1152_v10 = vmul.f32 -0.5, %v2715_v57  ;;  %v875_v42 = vadd.f32 %v755_v1, %v619_v43  ;;  %v707_v3 = vmul.f32 1.442695, %v2682_v52 }
  0xcc   : > { %1305 = vst [vmem:[%s2788_s24] sm:$0xff] %v1289_v38  ;;  %v1274_v2 = vsel %vm1018_vm7, %v2644_v4, %v1258_v62  ;;  %v758_v60 = vmul.f32 0.6931472, %v1876_v5  ;;  %v770_v19 = vmul.f32 %v2713_v51, %v769_v59  ;;  %v1155_v20 = vand.u32 2147483647, %v2715_v57 }
  0xcd   : > { %v1878_v63 = vpop.eup %1877  ;;  %v1290_v11 = vmul.f32 %v1274_v2, %v2776_v36  ;;  %v1139_v14 = vsel %vm2725_vm10, %v1136_v24, %v1133_v44  ;;  %v2807_v4 = vsel %vm635_vm9, %v2647_v6, %v875_v42  ;;  %v1153_v24 = vadd.f32 1.0, %v1152_v10 }
  0xce   : > { %v1259_v43 = vadd.f32 %v1139_v14, %v1003_v45  ;;  %v764_v52 = vsel %vm2730_vm11, %v761_v47, %v758_v60  ;;  %v1142_v22 = vmul.f32 0.6931472, %v1878_v63  ;;  %v1880_v15 = vpop.eup %1879  ;;  %1883 = vpow2.f32 %v707_v3  ;;  %v2876_v14 = vld [vmem:[#allocation5 + $0x48] sm:$0xff] }
  0xcf   : > { %1306 = vst [vmem:[%s2788_s24 + $0x8] sm:$0xff] %v1290_v11  ;;  %v876_v51 = vadd.f32 %v764_v52, %v620_v46  ;;  %v1070_v25 = vsub.f32 0.0, %v1054_v7  ;;  %v767_v8 = vmul.f32 0.6931472, %v1880_v15  ;;  %v687_v33 = vsub.f32 0.0, %v671_v12  ;;  %v2827_v46 = vld [vmem:[%s2635_s2 + $0x30] sm:$0xff] }
  0xd0   : > { %v1275_v6 = vsel %vm1019_vm12, %v2651_v9, %v1259_v43  ;;  %v1148_v45 = vsel %vm2745_vm14, %v1145_v35, %v1142_v22  ;;  %v1005_v40 = vmax.f32 %v2666_v29, 0.0  ;;  %v1154_v47 = vmul.f32 %v2715_v57, %v1153_v24  ;;  %v2864_v35 = vld [vmem:[%s2635_s2 + $0x40] sm:$0xff] }
  0xd1   : > { %v1291_v34 = vmul.f32 %v1275_v6, %v2807_v4  ;;  %v2834_v7 = vsel %vm636_vm13, %v2656_v18, %v876_v51  ;;  %v1260_v9 = vadd.f32 %v1148_v45, %v1004_v49  ;;  %v1091_v37 = vmul.f32 1.442695, %v1070_v25 }
  0xd2   : > { %v773_v39 = vsel %vm2782_vm0, %v770_v19, %v767_v8  ;;  %v709_v12 = vmul.f32 1.442695, %v687_v33  ;;  %v1055_v49 = vand.u32 2147483647, %v2827_v46  ;;  %vm1156_vm1 = vcmp.lt.f32.partialorder %v1155_v20, 0.0004427343 }
  0xd3   : > { %1307 = vst [vmem:[%s2788_s24 + $0x10] sm:$0xff] %v1291_v34  ;;  %v1276_v18 = vsel %vm1020_vm15, %v2659_v21, %v1260_v9  ;;  %1885 = vpow2.f32 %v1091_v37  ;;  %v1882_v23 = vpop.eup %1881  ;;  %v877_v55 = vadd.f32 %v773_v39, %v621_v50  ;;  %vm637_vm2 = vcmp.ne.f32.partialorder %v2662_v26, %v2662_v26 }
  0xd4   : > { %v1292_v48 = vmul.f32 %v1276_v18, %v2834_v7  ;;  %1887 = vpow2.f32 %v709_v12  ;;  %v1151_v21 = vmul.f32 0.6931472, %v1882_v23  ;;  %v1071_v32 = vsub.f32 0.0, %v1055_v49 }
  0xd5   : > { %v672_v57 = vand.u32 2147483647, %v2841_v16  ;;  %v1056_v27 = vand.u32 2147483647, %v2851_v13  ;;  %vm1021_vm3 = vcmp.ne.f32.partialorder %v2666_v29, %v2666_v29  ;;  %v2869_v41 = vsel %vm637_vm2, %v2662_v26, %v877_v55 }
  0xd6   : > { %1308 = vst [vmem:[%s2788_s24 + $0x18] sm:$0xff] %v1292_v48  ;;  %v1157_v50 = vsel %vm1156_vm1, %v1154_v47, %v1151_v21  ;;  %v1093_v28 = vmul.f32 1.442695, %v1071_v32  ;;  %v673_v61 = vand.u32 2147483647, %v2859_v56  ;;  %v622_v19 = vmax.f32 %v2668_v31, 0.0 }
  0xd7   : > { %v688_v30 = vsub.f32 0.0, %v672_v57  ;;  %v1261_v0 = vadd.f32 %v1157_v50, %v1005_v40  ;;  %v1072_v59 = vsub.f32 0.0, %v1056_v27  ;;  %v1057_v5 = vand.u32 2147483647, %v2864_v35  ;;  %v2893_v47 = vld [vmem:[%s2635_s2 + $0x48] sm:$0xff] }
  0xd8   : > { %v1884_v38 = vpop.eup %1883  ;;  %1889 = vpow2.f32 %v1093_v28  ;;  %v689_v2 = vsub.f32 0.0, %v673_v61  ;;  %v674_v24 = vand.u32 2147483647, %v2876_v14  ;;  %v623_v6 = vmax.f32 %v2687_v58, 0.0 }
  0xd9   : > { %v711_v62 = vmul.f32 1.442695, %v688_v30  ;;  %v1277_v1 = vsel %vm1021_vm3, %v2666_v29, %v1261_v0  ;;  %v774_v44 = vadd.f32 1.0, %v1884_v38  ;;  %v1095_v10 = vmul.f32 1.442695, %v1072_v59 }
  0xda   : > { %v1293_v54 = vmul.f32 %v1277_v1, %v2869_v41  ;;  %v1073_v26 = vsub.f32 0.0, %v1057_v5  ;;  %v777_v60 = vmul.f32 -0.5, %v1884_v38  ;;  %v713_v3 = vmul.f32 1.442695, %v689_v2  ;;  %v2912_v2 = vld [vmem:[#allocation5 + $0x50] sm:$0xff] }
  0xdb   : > { %1891 = vpow2.f32 %v711_v62  ;;  %v1006_v29 = vmax.f32 %v2685_v53, 0.0  ;;  %v780_v43 = vand.u32 2147483647, %v1884_v38  ;;  %vm638_vm4 = vcmp.ne.f32.partialorder %v2668_v31, %v2668_v31 }
  0xdc   : > { %1893 = vlog2.f32 %v774_v44  ;;  %1309 = vst [vmem:[%s2788_s24 + $0x20] sm:$0xff] %v1293_v54  ;;  %v1097_v22 = vmul.f32 1.442695, %v1073_v26  ;;  %v778_v15 = vadd.f32 1.0, %v777_v60  ;;  %v1007_v33 = vmax.f32 %v2827_v46, 0.0 }
  0xdd   : > { %v1886_v42 = vpop.eup %1885  ;;  %1895 = vpow2.f32 %v1095_v10  ;;  %v624_v34 = vmax.f32 %v2841_v16, 0.0  ;;  %v1008_v9 = vmax.f32 %v2851_v13, 0.0  ;;  %v690_v37 = vsub.f32 0.0, %v674_v24 }
  0xde   : > { %v1888_v63 = vpop.eup %1887  ;;  %v1158_v11 = vadd.f32 1.0, %v1886_v42  ;;  %1897 = vpow2.f32 %v713_v3  ;;  %v1161_v52 = vmul.f32 -0.5, %v1886_v42  ;;  %v1164_v25 = vand.u32 2147483647, %v1886_v42 }
  0xdf   : > { %v783_v20 = vadd.f32 1.0, %v1888_v63  ;;  %v786_v51 = vmul.f32 -0.5, %v1888_v63  ;;  %v789_v45 = vand.u32 2147483647, %v1888_v63  ;;  %vm2887_vm5 = vcmp.lt.f32.partialorder %v780_v43, 0.0004427343 }
  0xe0   : > { %1899 = vlog2.f32 %v1158_v11  ;;  %v1162_v40 = vadd.f32 1.0, %v1161_v52  ;;  %v625_v18 = vmax.f32 %v2859_v56, 0.0  ;;  %v779_v23 = vmul.f32 %v1884_v38, %v778_v15 }
  0xe1   : > { %1901 = vlog2.f32 %v783_v20  ;;  %vm1022_vm6 = vcmp.ne.f32.partialorder %v2685_v53, %v2685_v53  ;;  %v787_v48 = vadd.f32 1.0, %v786_v51  ;;  %v715_v21 = vmul.f32 1.442695, %v690_v37 }
  0xe2   : > { %1903 = vpow2.f32 %v1097_v22  ;;  %v1890_v8 = vpop.eup %1889  ;;  %vm2897_vm7 = vcmp.lt.f32.partialorder %v1164_v25, 0.0004427343  ;;  %vm2901_vm8 = vcmp.lt.f32.partialorder %v789_v45, 0.0004427343  ;;  %v1058_v59 = vand.u32 2147483647, %v2893_v47 }
  0xe3   : > { %v1167_v12 = vadd.f32 1.0, %v1890_v8  ;;  %v1170_v55 = vmul.f32 -0.5, %v1890_v8  ;;  %v1163_v61 = vmul.f32 %v1886_v42, %v1162_v40  ;;  %v1173_v38 = vand.u32 2147483647, %v1890_v8 }
  0xe4   : > { %vm639_vm9 = vcmp.ne.f32.partialorder %v2687_v58, %v2687_v58  ;;  %v788_v44 = vmul.f32 %v1888_v63, %v787_v48  ;;  %vm1023_vm10 = vcmp.ne.f32.partialorder %v2827_v46, %v2827_v46  ;;  %v1074_v22 = vsub.f32 0.0, %v1058_v59 }
  0xe5   : > { %v1892_v49 = vpop.eup %1891  ;;  %1905 = vlog2.f32 %v1167_v12  ;;  %v1171_v54 = vadd.f32 1.0, %v1170_v55  ;;  %vm2919_vm11 = vcmp.lt.f32.partialorder %v1173_v38, 0.0004427343  ;;  %vm640_vm12 = vcmp.ne.f32.partialorder %v2841_v16, %v2841_v16 }
  0xe6   : > { %v1894_v32 = vpop.eup %1893  ;;  %v792_v50 = vadd.f32 1.0, %v1892_v49  ;;  %v795_v0 = vmul.f32 -0.5, %v1892_v49  ;;  %1907 = vpow2.f32 %v715_v21  ;;  %v798_v10 = vand.u32 2147483647, %v1892_v49 }
  0xe7   : > { %v1896_v28 = vpop.eup %1895  ;;  %v776_v30 = vmul.f32 0.6931472, %v1894_v32  ;;  %v1172_v25 = vmul.f32 %v1890_v8, %v1171_v54  ;;  %vm1024_vm14 = vcmp.ne.f32.partialorder %v2851_v13, %v2851_v13  ;;  %v1099_v32 = vmul.f32 1.442695, %v1074_v22  ;;  %v2969_v54 = vld [vmem:[%s2635_s2 + $0x50] sm:$0xff]  ;;  %v2993_v22 = vld [vmem:[#allocation5 + $0x58] sm:$0xff] }
  0xe8   : > { %1909 = vlog2.f32 %v792_v50  ;;  %v1176_v62 = vadd.f32 1.0, %v1896_v28  ;;  %v2906_v5 = vpop.eup %1897  ;;  %v1179_v42 = vmul.f32 -0.5, %v1896_v28  ;;  %v796_v43 = vadd.f32 1.0, %v795_v0 }
  0xe9   : > { %v782_v1 = vsel %vm2887_vm5, %v779_v23, %v776_v30  ;;  %v801_v3 = vadd.f32 1.0, %v2906_v5  ;;  %v1182_v52 = vand.u32 2147483647, %v1896_v28  ;;  %v804_v45 = vmul.f32 -0.5, %v2906_v5 }
  0xea   : > { %v1900_v26 = vpop.eup %1899  ;;  %v878_v60 = vadd.f32 %v782_v1, %v622_v19  ;;  %1911 = vlog2.f32 %v1176_v62  ;;  %v675_v19 = vand.u32 2147483647, %v2912_v2  ;;  %v1180_v8 = vadd.f32 1.0, %v1179_v42 }
  0xeb   : > { %v1902_v11 = vpop.eup %1901  ;;  %v1160_v20 = vmul.f32 0.6931472, %v1900_v26  ;;  %1913 = vlog2.f32 %v801_v3  ;;  %v797_v23 = vmul.f32 %v1892_v49, %v796_v43  ;;  %vm2940_vm13 = vcmp.lt.f32.partialorder %v798_v10, 0.0004427343 }
  0xec   : > { %v2917_v15 = vpop.eup %1903  ;;  %v785_v63 = vmul.f32 0.6931472, %v1902_v11  ;;  %v2934_v39 = vsel %vm638_vm4, %v2668_v31, %v878_v60  ;;  %vm2946_vm15 = vcmp.lt.f32.partialorder %v1182_v52, 0.0004427343  ;;  %v805_v30 = vadd.f32 1.0, %v804_v45  ;;  %v3009_v45 = vld [vmem:[%s2635_s2 + $0x58] sm:$0xff] }
  0xed   : > { %v1166_v24 = vsel %vm2897_vm7, %v1163_v61, %v1160_v20  ;;  %v1185_v37 = vadd.f32 1.0, %v2917_v15  ;;  %v1188_v21 = vmul.f32 -0.5, %v2917_v15  ;;  %v691_v0 = vsub.f32 0.0, %v675_v19 }
  0xee   : > { %v1262_v40 = vadd.f32 %v1166_v24, %v1006_v29  ;;  %v791_v12 = vsel %vm2901_vm8, %v788_v44, %v785_v63  ;;  %v1181_v61 = vmul.f32 %v1896_v28, %v1180_v8  ;;  %vm641_vm0 = vcmp.ne.f32.partialorder %v2859_v56, %v2859_v56 }
  0xef   : > { %1915 = vlog2.f32 %v1185_v37  ;;  %v1906_v31 = vpop.eup %1905  ;;  %v879_v49 = vadd.f32 %v791_v12, %v623_v6  ;;  %v1191_v6 = vand.u32 2147483647, %v2917_v15  ;;  %v717_v44 = vmul.f32 1.442695, %v691_v0 }
  0xf0   : > { %v1278_v29 = vsel %vm1022_vm6, %v2685_v53, %v1262_v40  ;;  %v2957_v57 = vpop.eup %1907  ;;  %v1169_v50 = vmul.f32 0.6931472, %v1906_v31  ;;  %v807_v53 = vand.u32 2147483647, %v2906_v5  ;;  %1917 = vpow2.f32 %v1099_v32 }
  0xf1   : > { %v1294_v27 = vmul.f32 %v1278_v29, %v2934_v39  ;;  %v810_v38 = vadd.f32 1.0, %v2957_v57  ;;  %v2975_v28 = vsel %vm639_vm9, %v2687_v58, %v879_v49  ;;  %v1189_v60 = vadd.f32 1.0, %v1188_v21  ;;  %v3028_v49 = vld [vmem:[#allocation5 + $0x60] sm:$0xff] }
  0xf2   : > { %v1910_v59 = vpop.eup %1909  ;;  %v1175_v62 = vsel %vm2919_vm11, %v1172_v25, %v1169_v50  ;;  %v806_v11 = vmul.f32 %v2906_v5, %v805_v30  ;;  %vm2988_vm1 = vcmp.lt.f32.partialorder %v807_v53, 0.0004427343  ;;  %v1059_v52 = vand.u32 2147483647, %v2969_v54 }
  0xf3   : > { %1310 = vst [vmem:[%s2788_s24 + $0x28] sm:$0xff] %v1294_v27  ;;  %v794_v1 = vmul.f32 0.6931472, %v1910_v59  ;;  %v1263_v26 = vadd.f32 %v1175_v62, %v1007_v33  ;;  %1919 = vlog2.f32 %v810_v38  ;;  %v1009_v19 = vmax.f32 %v2864_v35, 0.0 }
  0xf4   : > { %v1912_v10 = vpop.eup %1911  ;;  %1921 = vpow2.f32 %v717_v44  ;;  %v1190_v24 = vmul.f32 %v2917_v15, %v1189_v60  ;;  %v1075_v25 = vsub.f32 0.0, %v1059_v52  ;;  %vm3014_vm2 = vcmp.lt.f32.partialorder %v1191_v6, 0.0004427343 }
  0xf5   : > { %v800_v42 = vsel %vm2940_vm13, %v797_v23, %v794_v1  ;;  %v1178_v3 = vmul.f32 0.6931472, %v1912_v10  ;;  %v1914_v20 = vpop.eup %1913  ;;  %v1279_v58 = vsel %vm1023_vm10, %v2827_v46, %v1263_v26  ;;  %v676_v8 = vand.u32 2147483647, %v2993_v22  ;;  %v3047_v26 = vld [vmem:[%s2635_s2 + $0x60] sm:$0xff] }
  0xf6   : > { %v880_v33 = vadd.f32 %v800_v42, %v624_v34  ;;  %v1295_v5 = vmul.f32 %v1279_v58, %v2975_v28  ;;  %v803_v51 = vmul.f32 0.6931472, %v1914_v20  ;;  %v1101_v48 = vmul.f32 1.442695, %v1075_v25  ;;  %v3061_v58 = vld [vmem:[%s2635_s2 + $0x68] sm:$0xff] }
  0xf7   : > { %v1184_v63 = vsel %vm2946_vm15, %v1181_v61, %v1178_v3  ;;  %v692_v31 = vsub.f32 0.0, %v676_v8  ;;  %v1060_v29 = vand.u32 2147483647, %v3009_v45  ;;  %vm1025_vm3 = vcmp.ne.f32.partialorder %v2864_v35, %v2864_v35  ;;  %v3051_v3 = vld [vmem:[#allocation5 + $0x68] sm:$0xff] }
  0xf8   : > { %v3003_v46 = vsel %vm640_vm12, %v2841_v16, %v880_v33  ;;  %v1264_v34 = vadd.f32 %v1184_v63, %v1008_v9  ;;  %1311 = vst [vmem:[%s2788_s24 + $0x30] sm:$0xff] %v1295_v5  ;;  %v809_v40 = vsel %vm2988_vm1, %v806_v11, %v803_v51  ;;  %v813_v16 = vmul.f32 -0.5, %v2957_v57 }
  0xf9   : > { %v1916_v37 = vpop.eup %1915  ;;  %v881_v15 = vadd.f32 %v809_v40, %v625_v18  ;;  %1923 = vpow2.f32 %v1101_v48  ;;  %v719_v27 = vmul.f32 1.442695, %v692_v31  ;;  %v1076_v50 = vsub.f32 0.0, %v1060_v29 }
  0xfa   : > { %v1280_v9 = vsel %vm1024_vm14, %v2851_v13, %v1264_v34  ;;  %v1187_v23 = vmul.f32 0.6931472, %v1916_v37  ;;  %v1918_v13 = vpop.eup %1917  ;;  %v814_v0 = vadd.f32 1.0, %v813_v16  ;;  %v677_v61 = vand.u32 2147483647, %v3028_v49 }
  0xfb   : > { %v1296_v55 = vmul.f32 %v1280_v9, %v3003_v46  ;;  %v3039_v18 = vsel %vm641_vm0, %v2859_v56, %v881_v15  ;;  %v1194_v59 = vadd.f32 1.0, %v1918_v13  ;;  %v816_v38 = vand.u32 2147483647, %v2957_v57 }
  0xfc   : > { %v1193_v21 = vsel %vm3014_vm2, %v1190_v24, %v1187_v23  ;;  %1925 = vpow2.f32 %v719_v27  ;;  %v1103_v62 = vmul.f32 1.442695, %v1076_v50  ;;  %v626_v1 = vmax.f32 %v2876_v14, 0.0 }
  0xfd   : > { %1312 = vst [vmem:[%s2788_s24 + $0x38] sm:$0xff] %v1296_v55  ;;  %v1265_v32 = vadd.f32 %v1193_v21, %v1009_v19  ;;  %v1920_v30 = vpop.eup %1919  ;;  %1927 = vlog2.f32 %v1194_v59  ;;  %v1197_v44 = vmul.f32 -0.5, %v1918_v13  ;;  %v815_v42 = vmul.f32 %v2957_v57, %v814_v0 }
  0xfe   : > { %v1922_v53 = vpop.eup %1921  ;;  %v812_v60 = vmul.f32 0.6931472, %v1920_v30  ;;  %1929 = vpow2.f32 %v1103_v62  ;;  %vm642_vm4 = vcmp.ne.f32.partialorder %v2876_v14, %v2876_v14  ;;  %vm3055_vm5 = vcmp.lt.f32.partialorder %v816_v38, 0.0004427343 }
  0xff   : > { %v1281_v6 = vsel %vm1025_vm3, %v2864_v35, %v1265_v32  ;;  %v819_v10 = vadd.f32 1.0, %v1922_v53  ;;  %v693_v35 = vsub.f32 0.0, %v677_v61  ;;  %v1010_v20 = vmax.f32 %v2893_v47, 0.0  ;;  %v3079_v32 = vld [vmem:[#allocation5 + $0x70] sm:$0xff] }
 0x100   : > { %v1297_v56 = vmul.f32 %v1281_v6, %v3039_v18  ;;  %v627_v33 = vmax.f32 %v2912_v2, 0.0  ;;  %v822_v43 = vmul.f32 -0.5, %v1922_v53  ;;  %v1061_v52 = vand.u32 2147483647, %v3047_v26 }
 0x101   : > { %1931 = vlog2.f32 %v819_v10  ;;  %v721_v57 = vmul.f32 1.442695, %v693_v35  ;;  %vm1026_vm6 = vcmp.ne.f32.partialorder %v2893_v47, %v2893_v47  ;;  %v1198_v5 = vadd.f32 1.0, %v1197_v44 }
 0x102   : > { %1313 = vst [vmem:[%s2788_s24 + $0x40] sm:$0xff] %v1297_v56  ;;  %v1200_v63 = vand.u32 2147483647, %v1918_v13  ;;  %v1011_v51 = vmax.f32 %v2969_v54, 0.0  ;;  %v678_v19 = vand.u32 2147483647, %v3051_v3  ;;  %v818_v24 = vsel %vm3055_vm5, %v815_v42, %v812_v60 }
 0x103   : > { %v3069_v34 = vpop.eup %1923  ;;  %1933 = vpow2.f32 %v721_v57  ;;  %v1077_v25 = vsub.f32 0.0, %v1061_v52  ;;  %v1062_v37 = vand.u32 2147483647, %v3061_v58  ;;  %v628_v12 = vmax.f32 %v2993_v22, 0.0 }
 0x104   : > { %v1203_v40 = vadd.f32 1.0, %v3069_v34  ;;  %v1012_v16 = vmax.f32 %v3009_v45, 0.0  ;;  %v694_v8 = vsub.f32 0.0, %v678_v19  ;;  %v823_v9 = vadd.f32 1.0, %v822_v43 }
 0x105   : > { %v825_v15 = vand.u32 2147483647, %v1922_v53  ;;  %v1105_v23 = vmul.f32 1.442695, %v1077_v25  ;;  %v1078_v48 = vsub.f32 0.0, %v1062_v37  ;;  %v882_v31 = vadd.f32 %v818_v24, %v626_v1 }
 0x106   : > { %v3077_v55 = vpop.eup %1925  ;;  %v1199_v29 = vmul.f32 %v1918_v13, %v1198_v5  ;;  %1935 = vlog2.f32 %v1203_v40  ;;  %v723_v21 = vmul.f32 1.442695, %v694_v8  ;;  %vm3081_vm7 = vcmp.lt.f32.partialorder %v1200_v63, 0.0004427343  ;;  %v3117_v8 = vld [vmem:[%s2635_s2 + $0x70] sm:$0xff] }
 0x107   : > { %v1928_v27 = vpop.eup %1927  ;;  %v1206_v30 = vmul.f32 -0.5, %v3069_v34  ;;  %v828_v0 = vadd.f32 1.0, %v3077_v55  ;;  %1937 = vpow2.f32 %v1105_v23  ;;  %vm643_vm8 = vcmp.ne.f32.partialorder %v2912_v2, %v2912_v2 }
 0x108   : > { %v1196_v59 = vmul.f32 0.6931472, %v1928_v27  ;;  %v629_v13 = vmax.f32 %v3028_v49, 0.0  ;;  %1939 = vpow2.f32 %v723_v21  ;;  %v1107_v61 = vmul.f32 1.442695, %v1078_v48  ;;  %v1930_v6 = vpop.eup %1929 }
 0x109   : > { %v824_v38 = vmul.f32 %v1922_v53, %v823_v9  ;;  %vm3090_vm9 = vcmp.lt.f32.partialorder %v825_v15, 0.0004427343  ;;  %1941 = vlog2.f32 %v828_v0  ;;  %v679_v56 = vand.u32 2147483647, %v3079_v32 }
 0x10a   : > { %v3099_v44 = vsel %vm642_vm4, %v2876_v14, %v882_v31  ;;  %v1202_v10 = vsel %vm3081_vm7, %v1199_v29, %v1196_v59  ;;  %v831_v60 = vmul.f32 -0.5, %v3077_v55  ;;  %v1212_v53 = vadd.f32 1.0, %v1930_v6 }
 0x10b   : > { %v1932_v1 = vpop.eup %1931  ;;  %v1266_v42 = vadd.f32 %v1202_v10, %v1010_v20  ;;  %vm1027_vm10 = vcmp.ne.f32.partialorder %v2969_v54, %v2969_v54  ;;  %v1207_v11 = vadd.f32 1.0, %v1206_v30  ;;  %1943 = vpow2.f32 %v1107_v61 }
 0x10c   : > { %v821_v35 = vmul.f32 0.6931472, %v1932_v1  ;;  %v1209_v43 = vand.u32 2147483647, %v3069_v34  ;;  %v834_v57 = vand.u32 2147483647, %v3077_v55  ;;  %1945 = vlog2.f32 %v1212_v53 }
 0x10d   : > { %v695_v14 = vsub.f32 0.0, %v679_v56  ;;  %v1934_v52 = vpop.eup %1933  ;;  %v1282_v20 = vsel %vm1026_vm6, %v2893_v47, %v1266_v42  ;;  %v1215_v63 = vmul.f32 -0.5, %v1930_v6  ;;  %v1013_v19 = vmax.f32 %v3047_v26, 0.0 }
 0x10e   : > { %v827_v5 = vsel %vm3090_vm9, %v824_v38, %v821_v35  ;;  %v1298_v24 = vmul.f32 %v1282_v20, %v3099_v44  ;;  %v832_v25 = vadd.f32 1.0, %v831_v60  ;;  %v1218_v37 = vand.u32 2147483647, %v1930_v6 }
 0x10f   : > { %v837_v40 = vadd.f32 1.0, %v1934_v52  ;;  %v883_v9 = vadd.f32 %v827_v5, %v627_v33  ;;  %v1208_v15 = vmul.f32 %v3069_v34, %v1207_v11  ;;  %vm644_vm11 = vcmp.ne.f32.partialorder %v2993_v22, %v2993_v22 }
 0x110   : > { %v630_v47 = vmax.f32 %v3051_v3, 0.0  ;;  %v725_v23 = vmul.f32 1.442695, %v695_v14  ;;  %v1936_v48 = vpop.eup %1935  ;;  %1314 = vst [vmem:[%s2788_s24 + $0x48] sm:$0xff] %v1298_v24  ;;  %vm3126_vm12 = vcmp.lt.f32.partialorder %v1209_v43, 0.0004427343  ;;  %vm1028_vm14 = vcmp.ne.f32.partialorder %v3009_v45, %v3009_v45 }
 0x111   : > { %vm3130_vm13 = vcmp.lt.f32.partialorder %v834_v57, 0.0004427343  ;;  %1947 = vlog2.f32 %v837_v40  ;;  %v840_v33 = vmul.f32 -0.5, %v1934_v52  ;;  %v1938_v21 = vpop.eup %1937  ;;  %v1205_v34 = vmul.f32 0.6931472, %v1936_v48  ;;  %v922_v40 = vld [vmem:[%s2626_s28 + $0x8] sm:$0xff] }
 0x112   : > { %v1216_v27 = vadd.f32 1.0, %v1215_v63  ;;  %1949 = vpow2.f32 %v725_v23  ;;  %v1063_v50 = vand.u32 2147483647, %v3117_v8  ;;  %v3137_v30 = vpop.eup %1939  ;;  %v833_v0 = vmul.f32 %v3077_v55, %v832_v25  ;;  %v3166_v63 = vld [vmem:[#allocation5 + $0x78] sm:$0xff] }
 0x113   : > { %vm3140_vm15 = vcmp.lt.f32.partialorder %v1218_v37, 0.0004427343  ;;  %v843_v61 = vand.u32 2147483647, %v1934_v52  ;;  %v1221_v38 = vadd.f32 1.0, %v1938_v21  ;;  %v1942_v62 = vpop.eup %1941  ;;  %v3148_v56 = vsel %vm643_vm8, %v2912_v2, %v883_v9 }
 0x114   : > { %v1211_v1 = vsel %vm3126_vm12, %v1208_v15, %v1205_v34  ;;  %v1224_v10 = vmul.f32 -0.5, %v1938_v21  ;;  %v846_v60 = vadd.f32 1.0, %v3137_v30  ;;  %v830_v53 = vmul.f32 0.6931472, %v1942_v62 }
 0x115   : > { %v1267_v55 = vadd.f32 %v1211_v1, %v1011_v51  ;;  %v841_v42 = vadd.f32 1.0, %v840_v33  ;;  %1951 = vlog2.f32 %v1221_v38  ;;  %v3156_v35 = vpop.eup %1943  ;;  %v1217_v11 = vmul.f32 %v1930_v6, %v1216_v27 }
 0x116   : > { %v1227_v2 = vand.u32 2147483647, %v1938_v21  ;;  %1953 = vlog2.f32 %v846_v60  ;;  %v1079_v43 = vsub.f32 0.0, %v1063_v50  ;;  %v1946_v57 = vpop.eup %1945  ;;  %v836_v51 = vsel %vm3130_vm13, %v833_v0, %v830_v53 }
 0x117   : > { %v1283_v14 = vsel %vm1027_vm10, %v2969_v54, %v1267_v55  ;;  %v849_v20 = vmul.f32 -0.5, %v3137_v30  ;;  %v1230_v5 = vadd.f32 1.0, %v3156_v35  ;;  %v884_v24 = vadd.f32 %v836_v51, %v628_v12 }
 0x118   : > { %v1299_v6 = vmul.f32 %v1283_v14, %v3148_v56  ;;  %v1214_v25 = vmul.f32 0.6931472, %v1946_v57  ;;  %vm645_vm0 = vcmp.ne.f32.partialorder %v3028_v49, %v3028_v49  ;;  %v1225_v37 = vadd.f32 1.0, %v1224_v10 }
 0x119   : > { %v842_v54 = vmul.f32 %v1934_v52, %v841_v42  ;;  %vm3178_vm1 = vcmp.lt.f32.partialorder %v843_v61, 0.0004427343  ;;  %1955 = vlog2.f32 %v1230_v5  ;;  %v1233_v9 = vmul.f32 -0.5, %v3156_v35  ;;  %v3207_v61 = vld [vmem:[%s2635_s2 + $0x78] sm:$0xff] }
 0x11a   : > { %1315 = vst [vmem:[%s2788_s24 + $0x50] sm:$0xff] %v1299_v6  ;;  %v1220_v12 = vsel %vm3140_vm15, %v1217_v11, %v1214_v25  ;;  %vm1029_vm2 = vcmp.ne.f32.partialorder %v3047_v26, %v3047_v26  ;;  %vm3188_vm3 = vcmp.lt.f32.partialorder %v1227_v2, 0.0004427343  ;;  %v1109_v52 = vmul.f32 1.442695, %v1079_v43  ;;  %v921_v6 = vld [vmem:[%s2626_s28] sm:$0xff] }
 0x11b   : > { %v680_v23 = vand.u32 2147483647, %v3166_v63  ;;  %v1948_v48 = vpop.eup %1947  ;;  %v3197_v31 = vsel %vm644_vm11, %v2993_v22, %v884_v24  ;;  %v1268_v29 = vadd.f32 %v1220_v12, %v1012_v16  ;;  %v850_v33 = vadd.f32 1.0, %v849_v20  ;;  %v3230_v11 = vld [vmem:[%s3676_s3] sm:$0x1] }
 0x11c   : > { %v852_v34 = vand.u32 2147483647, %v3137_v30  ;;  %v3202_v27 = vpop.eup %1949  ;;  %v839_v50 = vmul.f32 0.6931472, %v1948_v48  ;;  %v1226_v0 = vmul.f32 %v1938_v21, %v1225_v37  ;;  %vm646_vm4 = vcmp.ne.f32.partialorder %v3051_v3, %v3051_v3  ;;  %v3232_v2 = vld [vmem:[%s600_s15] sm:$0x1] }
 0x11d   : > { %1957 = vpow2.f32 %v1109_v52  ;;  %v696_v59 = vsub.f32 0.0, %v680_v23  ;;  %v1284_v22 = vsel %vm1028_vm14, %v3009_v45, %v1268_v29  ;;  %v1234_v16 = vadd.f32 1.0, %v1233_v9  ;;  %s3818_s15 = sld [smem:[#allocation27_spill]] }
 0x11e   : > { %v1236_v21 = vand.u32 2147483647, %v3156_v35  ;;  %v855_v38 = vadd.f32 1.0, %v3202_v27  ;;  %v1300_v62 = vmul.f32 %v1284_v22, %v3197_v31  ;;  %v845_v1 = vsel %vm3178_vm1, %v842_v54, %v839_v50  ;;  %v906_v50 = vld [vmem:[#allocation2 + $0x8] sm:$0xff] }
 0x11f   : > { %v858_v10 = vmul.f32 -0.5, %v3202_v27  ;;  %v727_v60 = vmul.f32 1.442695, %v696_v59  ;;  %v1952_v55 = vpop.eup %1951  ;;  %v885_v53 = vadd.f32 %v845_v1, %v629_v13  ;;  %v851_v45 = vmul.f32 %v3137_v30, %v850_v33 }
 0x120   : > { %1959 = vlog2.f32 %v855_v38  ;;  %v1064_v42 = vand.u32 2147483647, %v3207_v61  ;;  %v1954_v43 = vpop.eup %1953  ;;  %1316 = vst [vmem:[%s2788_s24 + $0x58] sm:$0xff] %v1300_v62  ;;  %v1223_v57 = vmul.f32 0.6931472, %v1952_v55  ;;  %v1014_v13 = vmax.f32 %v3061_v58, 0.0 }
 0x121   : > { %vm3235_vm5 = vcmp.lt.f32.partialorder %v852_v34, 0.0004427343  ;;  %1961 = vpow2.f32 %v727_v60  ;;  %v848_v30 = vmul.f32 0.6931472, %v1954_v43  ;;  %v1235_v51 = vmul.f32 %v3156_v35, %v1234_v16  ;;  %v923_v38 = vld [vmem:[%s2626_s28 + $0x10] sm:$0xff] }
 0x122   : > { %vm3241_vm6 = vcmp.lt.f32.partialorder %v1236_v21, 0.0004427343  ;;  %v1080_v5 = vsub.f32 0.0, %v1064_v42  ;;  %v1229_v24 = vsel %vm3188_vm3, %v1226_v0, %v1223_v57  ;;  %v859_v25 = vadd.f32 1.0, %v858_v10  ;;  %v924_v42 = vld [vmem:[%s2626_s28 + $0x18] sm:$0xff] }
 0x123   : > { %v861_v37 = vand.u32 2147483647, %v3202_v27  ;;  %v1325_v54 = vand.u32 2147483647, %v3230_v11  ;;  %v1956_v9 = vpop.eup %1955  ;;  %v3255_v35 = vsel %vm645_vm0, %v3028_v49, %v885_v53  ;;  %v1269_v12 = vadd.f32 %v1229_v24, %v1013_v19  ;;  %v905_v19 = vld [vmem:[#allocation2] sm:$0xff]  ;;  %v927_v24 = vld [vmem:[%s2626_s28 + $0x30] sm:$0xff] }
 0x124   : > { %v854_v15 = vsel %vm3235_vm5, %v851_v45, %v848_v30  ;;  %v1111_v52 = vmul.f32 1.442695, %v1080_v5  ;;  %v1232_v48 = vmul.f32 0.6931472, %v1956_v9  ;;  %v1349_v33 = vand.u32 2147483647, %v3232_v2 }
 0x125   : > { %v886_v23 = vadd.f32 %v854_v15, %v630_v47  ;;  %v1326_v29 = vsub.f32 0.0, %v1325_v54  ;;  %v1285_v49 = vsel %vm1029_vm2, %v3047_v26, %v1269_v12  ;;  %v937_v34 = vmul.f32 %v921_v6, %v2758_v17  ;;  %v907_v45 = vld [vmem:[#allocation2 + $0x10] sm:$0xff]  ;;  %v925_v5 = vld [vmem:[%s2626_s28 + $0x20] sm:$0xff]  ;;  %v926_v6 = vld [vmem:[%s2626_s28 + $0x28] sm:$0xff]  ;;  %p3822_p8 = scmp.ne.s32.totalorder %s3818_s15, 0 }
 0x126   : > { %1963 = vpow2.f32 %v1111_v52  ;;  %v938_v0 = vmul.f32 %v922_v40, %v2776_v36  ;;  %v1301_v47 = vmul.f32 %v1285_v49, %v3255_v35  ;;  %vm1030_vm7 = vcmp.ne.f32.partialorder %v3061_v58, %v3061_v58  ;;  %v928_v54 = vld [vmem:[%s2626_s28 + $0x38] sm:$0xff]  ;;  %v929_v40 = vld [vmem:[%s2626_s28 + $0x40] sm:$0xff]  ;;  %v931_v36 = vld [vmem:[%s2626_s28 + $0x50] sm:$0xff] }
 0x127   : > { %v3270_v59 = vpop.eup %1957  ;;  %v1238_v22 = vsel %vm3241_vm6, %v1235_v51, %v1232_v48  ;;  %v1327_v16 = vmul.f32 1.442695, %v1326_v29  ;;  %v3281_v26 = vsel %vm646_vm4, %v3051_v3, %v886_v23  ;;  %vm3283_vm8 = vcmp.lt.f32.partialorder %v861_v37, 0.0004427343  ;;  %v909_v52 = vld [vmem:[#allocation2 + $0x20] sm:$0xff]  ;;  %v910_v23 = vld [vmem:[#allocation2 + $0x28] sm:$0xff]  ;;  %p2105_p7 = pnand %p2104_p9, %p3822_p8 }
 0x128   : > { %v1270_v17 = vadd.f32 %v1238_v22, %v1014_v13  ;;  %v1239_v21 = vadd.f32 1.0, %v3270_v59  ;;  %1317 = vst [vmem:[%s2788_s24 + $0x60] sm:$0xff] %v1301_v47  ;;  %v1350_v62 = vsub.f32 0.0, %v1349_v33  ;;  %v953_v1 = vadd.f32 %v937_v34, %v905_v19  ;;  %v912_v19 = vld [vmem:[#allocation2 + $0x38] sm:$0xff]  ;;  %v913_v34 = vld [vmem:[#allocation2 + $0x40] sm:$0xff]  ;;  %v930_v22 = vld [vmem:[%s2626_s28 + $0x48] sm:$0xff] }
 0x129   : > { %1965 = vpow2.f32 %v1327_v16  ;;  %v954_v10 = vadd.f32 %v938_v0, %v906_v50  ;;  %v860_v3 = vmul.f32 %v3202_v27, %v859_v25  ;;  %v1242_v53 = vmul.f32 -0.5, %v3270_v59  ;;  %v908_v27 = vld [vmem:[#allocation2 + $0x18] sm:$0xff]  ;;  %p2106_p13 = pneg %p2105_p7 }
 0x12a   : > { %v1960_v60 = vpop.eup %1959  ;;  %v1286_v55 = vsel %vm1030_vm7, %v3061_v58, %v1270_v17  ;;  %1967 = vlog2.f32 %v1239_v21  ;;  %v1351_v13 = vmul.f32 1.442695, %v1350_v62  ;;  %969 = vst [vmem:[%s3298_s23] sm:$0xff] %v953_v1  ;;  %v939_v58 = vmul.f32 %v923_v38, %v2807_v4 }
 0x12b   : > { %v3294_v43 = vpop.eup %1961  ;;  %v1302_v57 = vmul.f32 %v1286_v55, %v3281_v26  ;;  %v857_v14 = vmul.f32 0.6931472, %v1960_v60  ;;  %970 = vst [vmem:[%s3298_s23 + $0x8] sm:$0xff] %v954_v10  ;;  %v631_v30 = vmax.f32 %v3079_v32, 0.0  ;;  %vm647_vm9 = vcmp.ne.f32.partialorder %v3079_v32, %v3079_v32  ;;  %v914_v10 = vld [vmem:[#allocation2 + $0x48] sm:$0xff]  ;;  %v932_v60 = vld [vmem:[%s2626_s28 + $0x58] sm:$0xff]  ;;  %p2113_p1 = pnand %p2112_p6, %p2106_p13 }
 0x12c   : > { %v1015_v51 = vmax.f32 %v3117_v8, 0.0  ;;  %v864_v20 = vadd.f32 1.0, %v3294_v43  ;;  %v867_v25 = vmul.f32 -0.5, %v3294_v43  ;;  %1969 = vpow2.f32 %v1351_v13 }
 0x12d   : > { %1318 = vst [vmem:[%s2788_s24 + $0x68] sm:$0xff] %v1302_v57  ;;  %v955_v37 = vadd.f32 %v939_v58, %v907_v45  ;;  %v940_v4 = vmul.f32 %v924_v42, %v2834_v7  ;;  %v863_v9 = vsel %vm3283_vm8, %v860_v3, %v857_v14  ;;  %v1243_v12 = vadd.f32 1.0, %v1242_v53  ;;  %v911_v7 = vld [vmem:[#allocation2 + $0x30] sm:$0xff]  ;;  %v916_v45 = vld [vmem:[#allocation2 + $0x58] sm:$0xff]  ;;  %v933_v58 = vld [vmem:[%s2626_s28 + $0x60] sm:$0xff] }
 0x12e   : > { %v1245_v15 = vand.u32 2147483647, %v3270_v59  ;;  %1971 = vlog2.f32 %v864_v20  ;;  %v941_v29 = vmul.f32 %v925_v5, %v2869_v41  ;;  %v942_v33 = vmul.f32 %v926_v6, %v2934_v39  ;;  %v915_v53 = vld [vmem:[#allocation2 + $0x50] sm:$0xff] }
 0x12f   : > { %971 = vst [vmem:[%s3298_s23 + $0x10] sm:$0xff] %v955_v37  ;;  %v956_v48 = vadd.f32 %v940_v4, %v908_v27  ;;  %v943_v49 = vmul.f32 %v927_v24, %v2975_v28  ;;  %vm1031_vm10 = vcmp.ne.f32.partialorder %v3117_v8, %v3117_v8  ;;  %v632_v0 = vmax.f32 %v3166_v63, 0.0  ;;  %v934_v27 = vld [vmem:[%s2626_s28 + $0x68] sm:$0xff] }
 0x130   : > { %v3323_v50 = vpop.eup %1963  ;;  %v944_v47 = vmul.f32 %v928_v54, %v3003_v46  ;;  %v945_v41 = vmul.f32 %v929_v40, %v3039_v18  ;;  %v887_v39 = vadd.f32 %v863_v9, %v631_v30  ;;  %v868_v16 = vadd.f32 1.0, %v867_v25  ;;  %v918_v37 = vld [vmem:[#allocation2 + $0x68] sm:$0xff] }
 0x131   : > { %v1248_v28 = vadd.f32 1.0, %v3323_v50  ;;  %972 = vst [vmem:[%s3298_s23 + $0x18] sm:$0xff] %v956_v48  ;;  %v957_v17 = vadd.f32 %v941_v29, %v909_v52  ;;  %v958_v21 = vadd.f32 %v942_v33, %v910_v23  ;;  %v959_v38 = vadd.f32 %v943_v49, %v911_v7  ;;  %v919_v33 = vld [vmem:[#allocation2 + $0x70] sm:$0xff] }
 0x132   : > { %v960_v62 = vadd.f32 %v944_v47, %v912_v19  ;;  %v961_v1 = vadd.f32 %v945_v41, %v913_v34  ;;  %v1244_v18 = vmul.f32 %v3270_v59, %v1243_v12  ;;  %vm3338_vm11 = vcmp.lt.f32.partialorder %v1245_v15, 0.0004427343  ;;  %v3388_v19 = vld [vmem:[%s3681_s8] sm:$0x1] }
 0x133   : > { %v3335_v46 = vpop.eup %1965  ;;  %vm648_vm12 = vcmp.ne.f32.partialorder %v3166_v63, %v3166_v63  ;;  %1973 = vlog2.f32 %v1248_v28  ;;  %973 = vst [vmem:[%s3298_s23 + $0x20] sm:$0xff] %v957_v17  ;;  %v946_v3 = vmul.f32 %v930_v22, %v3099_v44  ;;  %v870_v57 = vand.u32 2147483647, %v3294_v43  ;;  %974 = vst [vmem:[%s3298_s23 + $0x28] sm:$0xff] %v958_v21  ;;  %v3393_v34 = vld [vmem:[%s3682_s9] sm:$0x1] }
 0x134   : > { %v1968_v42 = vpop.eup %1967  ;;  %v1251_v59 = vmul.f32 -0.5, %v3323_v50  ;;  %v1329_v14 = vadd.f32 1.0, %v3335_v46  ;;  %975 = vst [vmem:[%s3298_s23 + $0x30] sm:$0xff] %v959_v38  ;;  %976 = vst [vmem:[%s3298_s23 + $0x38] sm:$0xff] %v960_v62  ;;  %v947_v13 = vmul.f32 %v931_v36, %v3148_v56  ;;  %v903_v44 = vsel %vm647_vm9, %v3079_v32, %v887_v39  ;;  %v917_v56 = vld [vmem:[#allocation2 + $0x60] sm:$0xff]  ;;  %v936_v36 = vld [vmem:[%s2626_s28 + $0x78] sm:$0xff] }
 0x135   : > { %977 = vst [vmem:[%s3298_s23 + $0x40] sm:$0xff] %v961_v1  ;;  %v1241_v30 = vmul.f32 0.6931472, %v1968_v42  ;;  %v962_v20 = vadd.f32 %v946_v3, %v914_v10  ;;  %v948_v5 = vmul.f32 %v932_v60, %v3197_v31  ;;  %v869_v6 = vmul.f32 %v3294_v43, %v868_v16  ;;  %v935_v43 = vld [vmem:[%s2626_s28 + $0x70] sm:$0xff]  ;;  %v920_v60 = vld [vmem:[#allocation2 + $0x78] sm:$0xff]  ;;  %s1449_s28 = sshll.u32 %s2788_s24, 4  ;;  %s3465_s28 = int_to_ptr.vmem [resolvable:$true] %s1449_s28 }
 0x136   : > { %1975 = vlog2.f32 %v1329_v14  ;;  %v1332_v24 = vmul.f32 -0.5, %v3335_v46  ;;  %v963_v25 = vadd.f32 %v947_v13, %v915_v53  ;;  %v3363_v4 = vpop.eup %1969  ;;  %v949_v40 = vmul.f32 %v933_v58, %v3255_v35 }
 0x137   : > { %v1247_v32 = vsel %vm3338_vm11, %v1244_v18, %v1241_v30  ;;  %978 = vst [vmem:[%s3298_s23 + $0x48] sm:$0xff] %v962_v20  ;;  %v964_v54 = vadd.f32 %v948_v5, %v916_v45  ;;  %v950_v31 = vmul.f32 %v934_v27, %v3281_v26  ;;  %vm3373_vm13 = vcmp.lt.f32.partialorder %v870_v57, 0.0004427343 }
 0x138   : > { %v1972_v9 = vpop.eup %1971  ;;  %v1271_v12 = vadd.f32 %v1247_v32, %v1015_v51  ;;  %v1252_v52 = vadd.f32 1.0, %v1251_v59  ;;  %v1353_v23 = vadd.f32 1.0, %v3363_v4  ;;  %979 = vst [vmem:[%s3298_s23 + $0x50] sm:$0xff] %v963_v25  ;;  %v1254_v29 = vand.u32 2147483647, %v3323_v50 }
 0x139   : > { %v866_v48 = vmul.f32 0.6931472, %v1972_v9  ;;  %980 = vst [vmem:[%s3298_s23 + $0x58] sm:$0xff] %v964_v54  ;;  %v965_v35 = vadd.f32 %v949_v40, %v917_v56  ;;  %v966_v26 = vadd.f32 %v950_v31, %v918_v37  ;;  %v1333_v7 = vadd.f32 1.0, %v1332_v24 }
 0x13a   : > { %v1287_v51 = vsel %vm1031_vm10, %v3117_v8, %v1271_v12  ;;  %1977 = vlog2.f32 %v1353_v23  ;;  %v951_v49 = vmul.f32 %v935_v43, %v903_v44  ;;  %v1016_v41 = vmax.f32 %v3207_v61, 0.0 }
 0x13b   : > { %v1303_v47 = vmul.f32 %v1287_v51, %v903_v44  ;;  %v872_v8 = vsel %vm3373_vm13, %v869_v6, %v866_v48  ;;  %v1356_v22 = vmul.f32 -0.5, %v3363_v4  ;;  %981 = vst [vmem:[%s3298_s23 + $0x60] sm:$0xff] %v965_v35  ;;  %982 = vst [vmem:[%s3298_s23 + $0x68] sm:$0xff] %v966_v26  ;;  %v1253_v16 = vmul.f32 %v3323_v50, %v1252_v52  ;;  %v1341_v6 = vld [vmem:[%s597_s13] sm:$0x1] }
 0x13c   : > { %v888_v39 = vadd.f32 %v872_v8, %v632_v0  ;;  %v1335_v28 = vand.u32 2147483647, %v3335_v46  ;;  %v967_v17 = vadd.f32 %v951_v49, %v919_v33  ;;  %vm3408_vm14 = vcmp.lt.f32.partialorder %v1254_v29, 0.0004427343 }
 0x13d   : > { %v1974_v21 = vpop.eup %1973  ;;  %1319 = vst [vmem:[%s2788_s24 + $0x70] sm:$0xff] %v1303_v47  ;;  %v1370_v62 = vand.u32 2147483647, %v3388_v19  ;;  %v1389_v0 = vand.u32 2147483647, %v3393_v34  ;;  %vm1032_vm15 = vcmp.ne.f32.partialorder %v3207_v61, %v3207_v61  ;;  %v1334_v10 = vmul.f32 %v3335_v46, %v1333_v7 }
 0x13e   : > { %v904_v50 = vsel %vm648_vm12, %v3166_v63, %v888_v39  ;;  %v1250_v1 = vmul.f32 0.6931472, %v1974_v21  ;;  %983 = vst [vmem:[%s3298_s23 + $0x70] sm:$0xff] %v967_v17  ;;  %v1357_v18 = vadd.f32 1.0, %v1356_v22  ;;  %v1322_v42 = vmax.f32 %v3230_v11, 0.0 }
 0x13f   : > { %v952_v55 = vmul.f32 %v936_v36, %v904_v50  ;;  %v1371_v3 = vsub.f32 0.0, %v1370_v62  ;;  %v1390_v53 = vsub.f32 0.0, %v1389_v0  ;;  %vm3431_vm0 = vcmp.lt.f32.partialorder %v1335_v28, 0.0004427343 }
 0x140   : > { %v1976_v63 = vpop.eup %1975  ;;  %v1256_v45 = vsel %vm3408_vm14, %v1253_v16, %v1250_v1  ;;  %v1359_v57 = vand.u32 2147483647, %v3363_v4  ;;  %vm1323_vm1 = vcmp.ne.f32.partialorder %v3230_v11, %v3230_v11  ;;  %v1346_v27 = vmax.f32 %v3232_v2, 0.0 }
 0x141   : > { %v1272_v59 = vadd.f32 %v1256_v45, %v1016_v41  ;;  %v1331_v14 = vmul.f32 0.6931472, %v1976_v63  ;;  %v968_v13 = vadd.f32 %v952_v55, %v920_v60  ;;  %v1372_v58 = vmul.f32 1.442695, %v1371_v3 }
 0x142   : > { %v1391_v44 = vmul.f32 1.442695, %v1390_v53  ;;  %v3455_v5 = vmul.f32 %v3363_v4, %v1357_v18  ;;  %vm3467_vm2 = vcmp.lt.f32.partialorder %v1359_v57, 0.0004427343 }
 0x143   : > { %v1288_v30 = vsel %vm1032_vm15, %v3207_v61, %v1272_v59  ;;  %v1337_v20 = vsel %vm3431_vm0, %v1334_v10, %v1331_v14  ;;  %984 = vst [vmem:[%s3298_s23 + $0x78] sm:$0xff] %v968_v13  ;;  %1979 = vpow2.f32 %v1372_v58  ;;  %s1407_s23 = scalar_lea.sflag [#allocation4], %s2619_s27 }
 0x144   : > { %v1978_v61 = vpop.eup %1977  ;;  %v1304_v24 = vmul.f32 %v1288_v30, %v904_v50  ;;  %v1338_v25 = vadd.f32 %v1337_v20, %v1322_v42  ;;  %1981 = vpow2.f32 %v1391_v44 }
 0x145   : > { %2116 = shalt.err (!%p2113_p1)
}
 0x146   : > { %s2117_s19 = scalar_lea.hbm %s3441_s10, 2048  ;;  %s2121_s0 = scalar_lea.hbm %s3817_s4, 6144 }
 0x147   : > { %p2118_p2 = scmp.ne.s32.totalorder %s3441_s10, %s2117_s19  ;;  %p2122_p0 = scmp.lt.u32.totalorder %s3441_s10, %s3817_s4 }
 0x148   : > { %p2123_p11 = scmp.lt.u32.totalorder %s2121_s0, %s2117_s19  ;;  %p2125_p9 = scmp.lt.u32.totalorder %s2117_s19, %s3441_s10 }
 0x149   : > { %p2119_p5 = pnand %p2118_p2, %p3822_p8 }
 0x14a   : > { %p2124_p3 = por %p2123_p11, %p2122_p0 }
 0x14b   : > { %p2120_p12 = pneg %p2119_p5 }
 0x14c   : > { %p2126_p7 = por %p2125_p9, %p2124_p3 }
 0x14e   : > { %p2127_p13 = pnand %p2126_p7, %p2120_p12 }
 0x150   : > { %2130 = shalt.err (!%p2127_p13)
}
 0x151   : > { %s2308_s25 = smov 128   ;;  %s2309_s26 = smov 8   ;;  %v1355_v37 = vmul.f32 0.6931472, %v1978_v61  ;;  %1320 = vst [vmem:[%s2788_s24 + $0x78] sm:$0xff] %v1304_v24  ;;  %v1339_v4 = vsel %vm1323_vm1, %v3230_v11, %v1338_v25  ;;  %vm1347_vm3 = vcmp.ne.f32.partialorder %v3232_v2, %v3232_v2 }
 0x152   : > { %1757 = dma.vmem_to_hbm [thread:$0]  (%p3822_p8), %s3443_s29, 2048, %s3441_s10, %s1407_s23, %s2308_s25, %s2308_s25, %s2309_s26   ;;  %v1342_v40 = vmul.f32 %v1341_v6, %v1339_v4 }
 0x153   : > { %s3713_s11 = scalar_lea.vmem [#allocation13], %s2619_s27  ;;  %s3823_s2 = sld [smem:[#allocation30_spill]]  ;;  %v1361_v54 = vsel %vm3467_vm2, %v3455_v5, %v1355_v37 }
 0x154   : > { %s3501_s20 = sshll.u32 %s3713_s11, 4  ;;  %s3714_s0 = scalar_lea.vmem [#allocation12], %s2619_s27  ;;  %s3566_s20 = int_to_ptr.vmem [resolvable:$true] %s3501_s20 }
 0x155   : > { %s3514_s29 = sshll.u32 %s3714_s0, 4  ;;  %s1735_s10 = sshll.u32 %s2410_s17, 4  ;;  %s3552_s29 = int_to_ptr.vmem [resolvable:$true] %s3514_s29 }
 0x156   : > { %s1412_s24 = scalar_lea.sflag [#allocation11], %s2616_s12  ;;  %s2131_s23 = scalar_lea.vmem %s3465_s28, 2048 }
 0x157   : > { %p2132_p10 = scmp.ne.s32.totalorder %s3465_s28, %s2131_s23  ;;  %s2310_s22 = smov [#allocation10]  }
 0x158   : > { %s2135_s21 = sshll.u32 %s2310_s22, 4  ;;  %s2136_s21 = int_to_ptr.vmem [resolvable:$false] %s2135_s21 }
 0x159   : > { %v1340_v32 = vld [vmem:[%s3823_s2] sm:$0x1]  ;;  %p2133_p4 = pnand %p2132_p10, %p3822_p8  ;;  %s2137_s19 = scalar_lea.vmem %s2136_s21, 4096 }
 0x15a   : > { %p2138_p1 = scmp.lt.s32.totalorder %s3465_s28, %s2136_s21  ;;  %p2139_p2 = scmp.lt.s32.totalorder %s2137_s19, %s2131_s23 }
 0x15b   : > { %p2134_p6 = pneg %p2133_p4 }
 0x15c   : > { %p2140_p5 = por %p2139_p2, %p2138_p1 }
 0x15e   : > { %p2141_p12 = pnand %p2140_p5, %p2134_p6 }
 0x160   : > { %2144 = shalt.err (!%p2141_p12)
}
 0x161   : > { %s2145_s13 = scalar_lea.hbm %s3463_s14, 2048  ;;  %s2149_s22 = scalar_lea.hbm %s3819_s18, 6144 }
 0x162   : > { %p2146_p0 = scmp.ne.s32.totalorder %s3463_s14, %s2145_s13  ;;  %p2150_p9 = scmp.lt.u32.totalorder %s3463_s14, %s3819_s18 }
 0x163   : > { %p2151_p7 = scmp.lt.u32.totalorder %s2149_s22, %s2145_s13  ;;  %p2153_p10 = scmp.lt.u32.totalorder %s2145_s13, %s3463_s14 }
 0x164   : > { %p2147_p11 = pnand %p2146_p0, %p3822_p8 }
 0x165   : > { %p2152_p13 = por %p2151_p7, %p2150_p9 }
 0x166   : > { %p2148_p3 = pneg %p2147_p11 }
 0x167   : > { %p2154_p4 = por %p2153_p10, %p2152_p13 }
 0x169   : > { %p2155_p6 = pnand %p2154_p4, %p2148_p3 }
 0x16b   : > { %2158 = shalt.err (!%p2155_p6)
}
 0x16c   : > { %1758 = dma.vmem_to_hbm [thread:$0]  (%p3822_p8), %s3465_s28, 2048, %s3463_s14, %s1412_s24, %s2308_s25, %s2308_s25, %s2309_s26   ;;  %v1362_v11 = vadd.f32 %v1361_v54, %v1346_v27  ;;  %v1343_v31 = vadd.f32 %v1342_v40, %v1340_v32 }
 0x16d   : > { %s3824_s23 = sld [smem:[#allocation34_spill]]  ;;  %s3825_s28 = scalar_lea.vmem [#allocation12], %s2619_s27 }
 0x16e   : > { %v1363_v43 = vsel %vm1347_vm3, %v3232_v2, %v1362_v11  ;;  %1344 = vst [vmem:[%s3825_s28] sm:$0x1] %v1343_v31  ;;  %s3826_s26 = sld [smem:[#allocation35_spill]]  ;;  %s2159_s2 = scalar_lea.vmem %s3552_s29, 16 }
 0x16f   : > { %v1364_v9 = vmul.f32 %v1363_v43, %v1339_v4  ;;  %p2160_p1 = scmp.ne.s32.totalorder %s3552_s29, %s2159_s2  ;;  %s2311_s22 = smov [#allocation12]  }
 0x170   : > { %s2163_s21 = sshll.u32 %s2311_s22, 4  ;;  %s2164_s21 = int_to_ptr.vmem [resolvable:$false] %s2163_s21 }
 0x171   : > { %p2161_p2 = pnand %p2160_p1, %p3822_p8  ;;  %s2165_s11 = scalar_lea.vmem %s2164_s21, 32 }
 0x172   : > { %p2166_p12 = scmp.lt.s32.totalorder %s3552_s29, %s2164_s21  ;;  %p2167_p0 = scmp.lt.s32.totalorder %s2165_s11, %s2159_s2 }
 0x173   : > { %s3559_s19 = scalar_lea.hbm %s3824_s23, %s1735_s10  ;;  %p2162_p5 = pneg %p2161_p2 }
 0x174   : > { %s3575_s13 = scalar_lea.hbm %s3826_s26, %s1735_s10  ;;  %p2168_p11 = por %p2167_p0, %p2166_p12 }
 0x176   : > { %p2169_p3 = pnand %p2168_p11, %p2162_p5 }
 0x178   : > { %2172 = shalt.err (!%p2169_p3)
}
 0x179   : > { %s2173_s10 = scalar_lea.hbm %s3559_s19, 16  ;;  %s2177_s14 = scalar_lea.hbm %s3824_s23, 48 }
 0x17a   : > { %p2174_p9 = scmp.ne.s32.totalorder %s3559_s19, %s2173_s10  ;;  %p2178_p10 = scmp.lt.u32.totalorder %s3559_s19, %s3824_s23 }
 0x17b   : > { %p2179_p4 = scmp.lt.u32.totalorder %s2177_s14, %s2173_s10  ;;  %p2181_p1 = scmp.lt.u32.totalorder %s2173_s10, %s3559_s19 }
 0x17c   : > { %p2175_p7 = pnand %p2174_p9, %p3822_p8 }
 0x17d   : > { %p2180_p6 = por %p2179_p4, %p2178_p10 }
 0x17e   : > { %p2176_p13 = pneg %p2175_p7 }
 0x17f   : > { %p2182_p2 = por %p2181_p1, %p2180_p6 }
 0x181   : > { %p2183_p5 = pnand %p2182_p2, %p2176_p13 }
 0x183   : > { %2186 = shalt.err (!%p2183_p5)
}
 0x184   : > { %1759 = dma.vmem_to_hbm [thread:$0]  (%p3822_p8), %s3552_s29, 16, %s3559_s19, %s1412_s24   ;;  %v1980_v2 = vpop.eup %1979 }
 0x185   : > { %s3827_s2 = scalar_lea.vmem [#allocation13], %s2619_s27  ;;  %v1982_v12 = vpop.eup %1981  ;;  %v1374_v15 = vadd.f32 1.0, %v1980_v2  ;;  %s1421_s21 = scalar_lea.sflag [#allocation14], %s2616_s12 }
 0x186   : > { %1365 = vst [vmem:[%s3827_s2] sm:$0x1] %v1364_v9  ;;  %s2187_s11 = scalar_lea.vmem %s3566_s20, 16  ;;  %s2312_s10 = smov [#allocation13]  }
 0x187   : > { %p2188_p12 = scmp.ne.s32.totalorder %s3566_s20, %s2187_s11  ;;  %s2191_s0 = sshll.u32 %s2312_s10, 4  ;;  %s2192_s0 = int_to_ptr.vmem [resolvable:$false] %s2191_s0 }
 0x188   : > { %s2193_s28 = scalar_lea.vmem %s2192_s0, 32  ;;  %p2194_p3 = scmp.lt.s32.totalorder %s3566_s20, %s2192_s0 }
 0x189   : > { %p2189_p0 = pnand %p2188_p12, %p3822_p8  ;;  %p2195_p9 = scmp.lt.s32.totalorder %s2193_s28, %s2187_s11 }
 0x18b   : > { %p2190_p11 = pneg %p2189_p0  ;;  %p2196_p7 = por %p2195_p9, %p2194_p3 }
 0x18d   : > { %p2197_p13 = pnand %p2196_p7, %p2190_p11 }
 0x18f   : > { %2200 = shalt.err (!%p2197_p13)
}
 0x190   : > { %s2201_s12 = scalar_lea.hbm %s3575_s13, 16  ;;  %s2205_s24 = scalar_lea.hbm %s3826_s26, 48 }
 0x191   : > { %p2202_p10 = scmp.ne.s32.totalorder %s3575_s13, %s2201_s12  ;;  %p2206_p1 = scmp.lt.u32.totalorder %s3575_s13, %s3826_s26 }
 0x192   : > { %p2207_p2 = scmp.lt.u32.totalorder %s2205_s24, %s2201_s12  ;;  %p2209_p12 = scmp.lt.u32.totalorder %s2201_s12, %s3575_s13 }
 0x193   : > { %p2203_p4 = pnand %p2202_p10, %p3822_p8 }
 0x194   : > { %p2208_p5 = por %p2207_p2, %p2206_p1 }
 0x195   : > { %p2204_p6 = pneg %p2203_p4 }
 0x196   : > { %p2210_p0 = por %p2209_p12, %p2208_p5 }
 0x198   : > { %p2211_p11 = pnand %p2210_p0, %p2204_p6 }
 0x19a   : > { %2214 = shalt.err (!%p2211_p11)
}
 0x19b   : > { %1760 = dma.vmem_to_hbm [thread:$0]  (%p3822_p8), %s3566_s20, 16, %s3575_s13, %s1421_s21   ;;  %v1393_v52 = vadd.f32 1.0, %v1982_v12  ;;  %1983 = vlog2.f32 %v1374_v15  ;;  %v1377_v23 = vmul.f32 -0.5, %v1980_v2  ;;  %v1396_v48 = vmul.f32 -0.5, %v1982_v12 }
 0x19c   : > { %v1380_v35 = vand.u32 2147483647, %v1980_v2  ;;  %v1399_v33 = vand.u32 2147483647, %v1982_v12  ;;  %v1367_v49 = vmax.f32 %v3388_v19, 0.0  ;;  %v1386_v22 = vmax.f32 %v3393_v34, 0.0 }
 0x19d   : > { %1985 = vlog2.f32 %v1393_v52  ;;  %v1378_v29 = vadd.f32 1.0, %v1377_v23  ;;  %v1397_v26 = vadd.f32 1.0, %v1396_v48  ;;  %vm1368_vm6 = vcmp.ne.f32.partialorder %v3388_v19, %v3388_v19  ;;  %s2313_s15 = smov [#allocation15]   ;;  %p3828_p3 = scmp.eq.s32.totalorder %s2410_s17, 2 }
 0x19e   : > { %vm1381_vm4 = vcmp.lt.f32.partialorder %v1380_v35, 0.0004427343  ;;  %vm1400_vm5 = vcmp.lt.f32.partialorder %v1399_v33, 0.0004427343  ;;  %vm1387_vm7 = vcmp.ne.f32.partialorder %v3393_v34, %v3393_v34  ;;  %s1489_s20 = sshll.u32 %s2313_s15, 4  ;;  %s1490_s20 = int_to_ptr.vmem [resolvable:$true] %s1489_s20 }
 0x19f   : > { %v1379_v51 = vmul.f32 %v1980_v2, %v1378_v29  ;;  %v1398_v47 = vmul.f32 %v1982_v12, %v1397_v26  ;;  %s2215_s13 = scalar_lea.vmem %s1490_s20, 16  ;;  %s2221_s25 = scalar_lea.vmem %s1490_s20, 32 }
 0x1a0   : > { %p2216_p8 = scmp.ne.s32.totalorder %s1490_s20, %s2215_s13  ;;  %p2222_p13 = scmp.lt.s32.totalorder %s1490_s20, %s1490_s20 }
 0x1a1   : > { %p2223_p10 = scmp.lt.s32.totalorder %s2221_s25, %s2215_s13 }
 0x1a2   : > { %p2217_p9 = pnand %p2216_p8, %p3828_p3 }
 0x1a3   : > { %p2224_p4 = por %p2223_p10, %p2222_p13 }
 0x1a4   : > { %p2218_p7 = pneg %p2217_p9 }
 0x1a5   : > { %v1984_v7 = vpop.eup %1983 }
 0x1a6   : > { %v1376_v41 = vmul.f32 0.6931472, %v1984_v7  ;;  %p2225_p6 = pnand %p2224_p4, %p2218_p7 }
 0x1a7   : > { %v1986_v8 = vpop.eup %1985 }
 0x1a8   : > { %v1395_v39 = vmul.f32 0.6931472, %v1986_v8  ;;  %v1382_v16 = vsel %vm1381_vm4, %v1379_v51, %v1376_v41 }
 0x1a9   : > { %v1383_v28 = vadd.f32 %v1382_v16, %v1367_v49 }
 0x1aa   : > { %v1401_v17 = vsel %vm1400_vm5, %v1398_v47, %v1395_v39 }
 0x1ab   : > { %v1402_v36 = vadd.f32 %v1401_v17, %v1386_v22  ;;  %v1384_v21 = vsel %vm1368_vm6, %v3388_v19, %v1383_v28 }
 0x1ad   : > { %v1403_v38 = vsel %vm1387_vm7, %v3393_v34, %v1402_v36 }
 0x1ae   : > { %v1404_v62 = vmul.f32 %v1403_v38, %v1384_v21 }
 0x1b0   : > { %1405 = vst [vmem:[#allocation15] sm:$0x1] %v1404_v62 }
 0x1b1   : > { %2228 = shalt.err (!%p2225_p6)
}
 0x1b2   : > { %s3829_s21 = sld [smem:[#allocation36_spill]]  ;;  %p3830_p2 = pmov %p3828_p3 }
 0x1b8   : > { %s2229_s11 = scalar_lea.hbm %s3829_s21, 16 }
 0x1b9   : > { %p2230_p1 = scmp.ne.s32.totalorder %s3829_s21, %s2229_s11  ;;  %p2235_p0 = scmp.lt.u32.totalorder %s2229_s11, %s3829_s21 }
 0x1bb   : > { %p2231_p5 = pnand %p2230_p1, %p3830_p2 }
 0x1bd   : > { %p2232_p12 = pneg %p2231_p5 }
 0x1bf   : > { %p2237_p11 = pnand %p2235_p0, %p2232_p12 }
 0x1c1   : > { %2240 = shalt.err (!%p2237_p11)
}
 0x1c2   : > { %p3831_p8 = pmov %p3830_p2  ;;  %p3832_p3 = pmov %p3830_p2 }
 0x1c4   : > { %1762 = dma.vmem_to_hbm [thread:$0]  (%p3831_p8), %s1490_s20, 16, %s3829_s21, [#allocation14]  }
 0x1c5   : > { %2270 = dma.done.wait (%p3832_p3), [#allocation14], 16   ;;  %p3833_p9 = pmov %p3830_p2 }
 0x1c7   : > { %2272 = vsyncadd (%p3833_p9), [#allocation14], 4294967280 }
 0x1c8 PF: > { %s3834_s24 = sld [smem:[#allocation23_spill]]  ;;  %s3835_s19 = sld [smem:[#allocation28_spill]] }
 0x1c9   : > { %p1803_p7 = scmp.ge.s32.totalorder %s2299_s16, 2 }
 0x1ce   : > { %s1505_s14 = sand.u32 1, %s3834_s24   ;;  %p3836_p13 = scmp.ne.s32.totalorder %s3835_s19, 0 }
 0x1cf   : > { %s1506_s15 = scalar_lea.sflag [#allocation4], %s1505_s14 }
 0x1d0   : > { %p1784_p10 = pnand %p1803_p7, %p3836_p13 }
 0x1d2   : > { %2274 = dma.done.wait (!%p1784_p10), %s1506_s15, 2048  }
 0x1d3   : > { %2276 = vsyncadd (!%p1784_p10), %s1506_s15, 4294965248  ;;  %s3837_s13 = sadd.s32 4294967294, %s2299_s16  }
 0x1d4   : > { %s1514_s25 = sand.u32 1, %s3837_s13  }
 0x1d5   : > { %s1515_s20 = scalar_lea.sflag [#allocation11], %s1514_s25 }
 0x1d6   : > { %2278 = dma.done.wait (!%p1784_p10), %s1515_s20, 2064  }
 0x1d7   : > { %2280 = vsyncadd (!%p1784_p10), %s1515_s20, 4294965232  ;;  %s1532_s22 = scalar_lea.sflag [#allocation14], %s1514_s25 }
 0x1d8   : > { %2282 = dma.done.wait (!%p1784_p10), %s1532_s22, 16  }
 0x1d9   : > { %2284 = vsyncadd (!%p1784_p10), %s1532_s22, 4294967280  ;;  %s3838_s16 = sld [smem:[#allocation25_spill]]  ;;  %s3839_s17 = sld [smem:[#allocation24_spill]] }
 0x1da   : > { %s3840_s15 = sld [smem:[#allocation26_spill]]  ;;  %s3841_s29 = smov %s2291_s30 }
 0x1df   : > { %p33_p4 = scmp.ge.s32.totalorder %s3838_s16, 5   ;;  %s3842_s30 = smov %s3839_s17 }
 0x1e1   :  { %35 = sbr.rel (!%p33_p4) target bundleno = 18 (0x12), region = 186 }
 0x1e8   :  { %1536 = vsyncpa [#allocation3], 1 }
 0x1e9   :  { %1538 = vsyncpa [#allocation3 + $0x1], 1 }
 0x1ea   :  { %1539 = vsyncpa [#allocation6], 1 }
 0x1eb   :  { %1540 = vsyncpa [#allocation4], 1 }
 0x1ec   :  { %1542 = vsyncpa [#allocation4 + $0x1], 1 }
 0x1ed   :  { %1543 = vsyncpa [#allocation11], 1 }
 0x1ee   :  { %1545 = vsyncpa [#allocation11 + $0x1], 1 }
 0x1ef   :  { %1546 = vsyncpa [#allocation14], 1 }
 0x1f0   :  { %1548 = vsyncpa [#allocation14 + $0x1], 1 }

</bundles_post_ra>
